<compile_context>
chip_gen: v7x
topology: tpu7x:2x2x1
jax: 0.10.0
libtpu: 0.0.40
codegen_flags: <defaults>
</compile_context>

<pallas_src>
import functools

import jax
import jax.numpy as jnp
from jax import lax
from jax.experimental import pallas as pl
from jax.experimental.pallas import tpu as pltpu


# --------------------------------- helpers -------------------------------------
def _round_up(x, m):
    return (x + m - 1) // m * m


def _pad_last(a, n):
    pad = n - a.shape[-1]
    if pad == 0:
        return a
    widths = [(0, 0)] * (a.ndim - 1) + [(0, pad)]
    return jnp.pad(a, widths)


def _vmem_budget_bytes():
    """Generation-aware VMEM budget (leave ~25% headroom, cap at 100 MiB)."""
    cap = 64 * 1024 * 1024  # conservative default (v7x per-TC VMEM)
    try:
        info = pltpu.get_tpu_info()
        cap = int(getattr(info, "vmem_capacity_bytes", cap))
    except Exception:
        pass
    return min(cap * 3 // 4, 100 * 1024 * 1024)


def _footprint_bytes(TH, W, c1, C2p, x_bytes, cd_bytes):
    """Estimated VMEM use of one grid step: double-buffered I/O tiles + resident
    weights + in-kernel f32 conv-slab temporaries."""
    rows3 = TH + 2
    io = 2 * (TH * W + 2 * W) * c1 * x_bytes + 2 * TH * W * c1 * x_bytes
    wts = 2 * (2 * c1 * C2p * cd_bytes + (12 * C2p + c1) * 4)
    tmp = (rows3 * W * c1 * cd_bytes          # concatenated x operand
           + 3 * rows3 * W * C2p * 4          # h3, h_l, h_r
           + TH * W * C2p * 4                 # conv accumulator
           + TH * W * C2p * cd_bytes)         # fc2 operand cast
    return io + wts + tmp + (1 << 20)         # ~1 MiB slack


def _pick_row_tile(H, W, c1, C2p, x_bytes, cd_bytes, budget):
    """Largest row tile TH dividing H whose footprint fits the VMEM budget."""
    for th in range(H, 0, -1):
        if H % th == 0 and _footprint_bytes(th, W, c1, C2p, x_bytes, cd_bytes) <= budget:
            return th
    return 1


# ------------------------------ fused kernel ------------------------------------
def _mixd_ffn_kernel(x_mid_ref, x_top_ref, x_bot_ref,
                     w1_ref, b1_ref, dww_ref, dwb_ref, w2_ref, b2_ref,
                     o_ref, *, H, W, TH, compute_dtype):
    # x_mid_ref: (TH*W, c1)  x_top_ref/x_bot_ref: (W, c1)   (halo rows, index-clamped)
    # w1_ref: (c1, C2p) [compute_dtype]   b1_ref: (1, C2p) f32
    # dww_ref: (9, C2p) f32 (row ky*3+kx)  dwb_ref: (1, C2p) f32
    # w2_ref: (C2p, c1) [compute_dtype]   b2_ref: (1, c1) f32
    # o_ref: (TH*W, c1)
    i = pl.program_id(1)
    base = i * TH
    rows3 = TH + 2
    C2p = w1_ref.shape[1]
    cd = compute_dtype

    # ---------------- fc1 on tile rows + 1 halo row above/below (one matmul) ------
    # Conv padding is applied AFTER fc1+bias in the PyTorch module, so halo rows that
    # fall outside the image must become exact zeros: zero the (tiny) x halo rows and
    # scale the bias per-row so those rows get no bias either.
    xt = x_top_ref[...]
    xb = x_bot_ref[...]
    xt = jnp.where(base > 0, xt, jnp.zeros_like(xt))          # (W, c1) — tiny
    xb = jnp.where(base + TH < H, xb, jnp.zeros_like(xb))
    x3 = jnp.concatenate([xt, x_mid_ref[...], xb], axis=0).astype(cd)   # ((TH+2)*W, c1)

    h3 = jnp.dot(x3, w1_ref[...], preferred_element_type=jnp.float32)   # f32 acc
    h3 = h3.reshape(rows3, W, C2p)

    vt = (base > 0).astype(jnp.float32)
    vb = (base + TH < H).astype(jnp.float32)
    row = lax.broadcasted_iota(jnp.int32, (rows3, 1, 1), 0)
    rscale = jnp.where(row == 0, vt, jnp.where(row == rows3 - 1, vb, 1.0))
    h3 = h3 + b1_ref[...].reshape(1, 1, C2p) * rscale         # (rows3,1,C2p) bcast

    # ---------------- depthwise 3x3, pad=1 ----------------------------------------
    # Horizontal shifts via XLU roll (unmasked); the wrapped boundary column is
    # zeroed by folding a (1,W,1) column mask into the per-tap weights (no full-slab
    # selects). Vertical shifts are static outer-axis slices of the halo slab.
    h_l = pltpu.roll(h3, shift=1, axis=1)          # w <- w-1 (wraps at w = 0)
    h_r = pltpu.roll(h3, shift=W - 1, axis=1)      # w <- w+1 (wraps at w = W-1)
    shifted = (h_l, h3, h_r)

    col = lax.broadcasted_iota(jnp.int32, (1, W, 1), 1)
    mask_l = (col != 0).astype(jnp.float32)        # kill wrapped column 0
    mask_r = (col != W - 1).astype(jnp.float32)    # kill wrapped column W-1

    wk = dww_ref[...]                              # (9, C2p) f32
    acc = jnp.zeros((TH, W, C2p), jnp.float32)
    for ky in range(3):
        for kx in range(3):
            t = ky * 3 + kx
            w_tap = wk[t:t + 1, :].reshape(1, 1, C2p)
            if kx == 0:
                w_tap = w_tap * mask_l             # (1, W, C2p) — built once per tap
            elif kx == 2:
                w_tap = w_tap * mask_r
            acc = acc + shifted[kx][ky:ky + TH] * w_tap
    ax = acc + dwb_ref[...].reshape(1, 1, C2p)     # (TH, W, C2p)

    # ---------------- fc2 ----------------------------------------------------------
    # NOTE: GELU(ax + fc1(x)) of the PyTorch module is dead code for fuse_mode='add'.
    out = jnp.dot(ax.reshape(TH * W, C2p).astype(cd), w2_ref[...],
                  preferred_element_type=jnp.float32) + b2_ref[...]
    o_ref[...] = out.astype(o_ref.dtype)


# ------------------------------- wrapper ----------------------------------------
def mixd_ffn(x, H, W, params, *, compute_dtype=jnp.bfloat16, row_tile=None):
    """x: (B, N, c1) with N = H*W. Returns (B, N, c1).

    compute_dtype controls the MXU operand dtype only (accumulation is always f32,
    depthwise-conv math is always f32). Use jnp.float32 for exact parity with the
    PyTorch reference.
    """
    B, N, c1 = x.shape
    assert N == H * W
    assert W % 8 == 0, "W must be a multiple of 8 (sublane axis of the conv slabs)"
    # TODO(synk): support W not a multiple of 8 (needs padded-W conv handling).
    c2 = params["w1"].shape[1]
    C2p = _round_up(c2, 128)            # lane-dense hidden channels
    cd = compute_dtype

    # weights: pad the hidden (C2p) dim once, pre-cast MXU operands to compute dtype
    w1 = _pad_last(params["w1"], C2p).astype(cd)                     # (c1, C2p)
    b1 = _pad_last(params["b1"], C2p).astype(jnp.float32)            # (1, C2p)
    dww = _pad_last(params["dw_w"], C2p).astype(jnp.float32)         # (9, C2p)
    dwb = _pad_last(params["dw_b"], C2p).astype(jnp.float32)         # (1, C2p)
    w2 = jnp.pad(params["w2"], ((0, C2p - c2), (0, 0))).astype(cd)   # (C2p, c1)
    b2 = params["b2"].astype(jnp.float32)                            # (1, c1)

    x_bytes = jnp.dtype(x.dtype).itemsize
    cd_bytes = jnp.dtype(cd).itemsize
    budget = _vmem_budget_bytes()
    TH = (row_tile if row_tile is not None
          else _pick_row_tile(H, W, c1, C2p, x_bytes, cd_bytes, budget))
    assert H % TH == 0
    grid = (B, H // TH)

    kernel = functools.partial(_mixd_ffn_kernel, H=H, W=W, TH=TH, compute_dtype=cd)

    out = pl.pallas_call(
        kernel,
        out_shape=jax.ShapeDtypeStruct((B, N, c1), x.dtype),
        grid_spec=pltpu.PrefetchScalarGridSpec(
            num_scalar_prefetch=0,
            grid=grid,
            in_specs=[
                # streamed row tile of x (TH image rows)
                pl.BlockSpec((None, TH * W, c1), lambda b, i: (b, i, 0)),
                # 1-row halo above / below (block size = W rows -> block index = row)
                pl.BlockSpec((None, W, c1),
                             lambda b, i, TH=TH: (b, jnp.maximum(i * TH - 1, 0), 0)),
                pl.BlockSpec((None, W, c1),
                             lambda b, i, TH=TH, H=H: (b, jnp.minimum(i * TH + TH, H - 1), 0)),
                # weights / biases: invariant -> DMA'd once, stay in VMEM
                pl.BlockSpec((c1, C2p), lambda b, i: (0, 0)),
                pl.BlockSpec((1, C2p), lambda b, i: (0, 0)),
                pl.BlockSpec((9, C2p), lambda b, i: (0, 0)),
                pl.BlockSpec((1, C2p), lambda b, i: (0, 0)),
                pl.BlockSpec((C2p, c1), lambda b, i: (0, 0)),
                pl.BlockSpec((1, c1), lambda b, i: (0, 0)),
            ],
            out_specs=pl.BlockSpec((None, TH * W, c1), lambda b, i: (b, i, 0)),
        ),
        compiler_params=pltpu.CompilerParams(
            dimension_semantics=("parallel", "parallel"),
            vmem_limit_bytes=budget,
        ),
    )(x, x, x, w1, b1, dww, dwb, w2, b2)
    return out


# --------------------------- reference (plain JAX) -------------------------------
def mixd_ffn_ref(x, H, W, p):
    B, N, c1 = x.shape
    c2 = p["w1"].shape[1]
    h = x @ p["w1"] + p["b1"][0]
    h4 = h.reshape(B, H, W, c2)
    hp = jnp.pad(h4, ((0, 0), (1, 1), (1, 1), (0, 0)))
    dw = p["dw_w"].reshape(3, 3, c2)
    acc = jnp.zeros_like(h4)
    for ky in range(3):
        for kx in range(3):
            acc = acc + hp[:, ky:ky + H, kx:kx + W, :] * dw[ky, kx]
    ax = acc + p["dw_b"][0]
    out = ax.reshape(B, N, c2) @ p["w2"] + p["b2"][0]
    return out


if __name__ == "__main__":
    B, H, W = 2, 16, 16
    N = H * W
    c1, c2 = 32, 64

    key = jax.random.PRNGKey(0)
    ks = jax.random.split(key, 7)
    params = {
        "w1": jax.random.normal(ks[0], (c1, c2), jnp.float32) * 0.1,
        "b1": jax.random.normal(ks[1], (1, c2), jnp.float32) * 0.1,
        # depthwise kernel: dw_w[ky*3+kx, c] == torch conv weight[c, 0, ky, kx]
        "dw_w": (jax.random.normal(ks[2], (3, 3, c2), jnp.float32) * 0.1).reshape(9, c2),
        "dw_b": jax.random.normal(ks[3], (1, c2), jnp.float32) * 0.1,
        "w2": jax.random.normal(ks[4], (c2, c1), jnp.float32) * 0.1,
        "b2": jax.random.normal(ks[5], (1, c1), jnp.float32) * 0.1,
    }
    x = jax.random.normal(ks[6], (B, N, c1), jnp.float32)

    ref = jax.block_until_ready(mixd_ffn_ref(x, H, W, params))

    # exact f32 path, auto-chosen tile
    out_f32 = jax.block_until_ready(mixd_ffn(x, H, W, params, compute_dtype=jnp.float32))
    assert out_f32.shape == (B, N, c1)
    assert jnp.allclose(out_f32, ref, rtol=1e-4, atol=1e-4), \
        float(jnp.max(jnp.abs(out_f32 - ref)))

    # exact f32 path, multi-tile: exercises the streamed-tile 1-row halo logic
    out_f32_t = jax.block_until_ready(
        mixd_ffn(x, H, W, params, compute_dtype=jnp.float32, row_tile=4))
    assert jnp.allclose(out_f32_t, ref, rtol=1e-4, atol=1e-4), \
        float(jnp.max(jnp.abs(out_f32_t - ref)))

    # default bf16-MXU path (f32 accumulate) -- looser tolerance
    out_bf16 = jax.block_until_ready(mixd_ffn(x, H, W, params, row_tile=8))
    assert jnp.allclose(out_bf16, ref, rtol=3e-2, atol=3e-2), \
        float(jnp.max(jnp.abs(out_bf16 - ref)))

    print("KERNEL_OK")
</pallas_src>

<mosaic_0001>
module attributes {stable_mosaic.version = 11 : i64} {
  func.func @_mixd_ffn_kernel(%arg0: i32, %arg1: i32, %arg2: memref<1x256x32xf32, #tpu.memory_space<vmem>>, %arg3: memref<1x16x32xf32, #tpu.memory_space<vmem>>, %arg4: memref<1x16x32xf32, #tpu.memory_space<vmem>>, %arg5: memref<32x128xf32, #tpu.memory_space<vmem>>, %arg6: memref<1x128xf32, #tpu.memory_space<vmem>>, %arg7: memref<9x128xf32, #tpu.memory_space<vmem>>, %arg8: memref<1x128xf32, #tpu.memory_space<vmem>>, %arg9: memref<128x32xf32, #tpu.memory_space<vmem>>, %arg10: memref<1x32xf32, #tpu.memory_space<vmem>>, %arg11: memref<1x256x32xf32, #tpu.memory_space<vmem>>) attributes {dimension_semantics = [#tpu.dimension_semantics<parallel>, #tpu.dimension_semantics<parallel>], iteration_bounds = array<i64: 2, 1>, scalar_prefetch = 0 : i64, scratch_operands = 0 : i64, tpu.core_type = #tpu.core_type<tc>, window_params = [{transform_indices = @transform_0, window_bounds = array<i64: 1, 256, 32>}, {transform_indices = @transform_1, window_bounds = array<i64: 1, 16, 32>}, {transform_indices = @transform_2, window_bounds = array<i64: 1, 16, 32>}, {pipeline_mode = #tpu.pipeline_mode<synchronous>, transform_indices = @transform_3, window_bounds = array<i64: 32, 128>}, {pipeline_mode = #tpu.pipeline_mode<synchronous>, transform_indices = @transform_4, window_bounds = array<i64: 1, 128>}, {pipeline_mode = #tpu.pipeline_mode<synchronous>, transform_indices = @transform_5, window_bounds = array<i64: 9, 128>}, {pipeline_mode = #tpu.pipeline_mode<synchronous>, transform_indices = @transform_6, window_bounds = array<i64: 1, 128>}, {pipeline_mode = #tpu.pipeline_mode<synchronous>, transform_indices = @transform_7, window_bounds = array<i64: 128, 32>}, {pipeline_mode = #tpu.pipeline_mode<synchronous>, transform_indices = @transform_8, window_bounds = array<i64: 1, 32>}, {transform_indices = @transform_9, window_bounds = array<i64: 1, 256, 32>}]} {
    %c16_i32 = arith.constant 16 : i32
    %0 = arith.muli %arg1, %c16_i32 : i32
    %c0 = arith.constant 0 : index
    %c0_0 = arith.constant 0 : index
    %c0_1 = arith.constant 0 : index
    %1 = vector.load %arg3[%c0, %c0_0, %c0_1] : memref<1x16x32xf32, #tpu.memory_space<vmem>>, vector<1x16x32xf32>
    %2 = vector.shape_cast %1 : vector<1x16x32xf32> to vector<16x32xf32>
    %c0_2 = arith.constant 0 : index
    %c0_3 = arith.constant 0 : index
    %c0_4 = arith.constant 0 : index
    %3 = vector.load %arg4[%c0_2, %c0_3, %c0_4] : memref<1x16x32xf32, #tpu.memory_space<vmem>>, vector<1x16x32xf32>
    %4 = vector.shape_cast %3 : vector<1x16x32xf32> to vector<16x32xf32>
    %c0_i32 = arith.constant 0 : i32
    %5 = arith.cmpi sgt, %0, %c0_i32 : i32
    %cst = arith.constant 0.000000e+00 : f32
    %6 = vector.broadcast %cst : f32 to vector<16x32xf32>
    %7 = arith.select %5, %2, %6 : vector<16x32xf32>
    %c16_i32_5 = arith.constant 16 : i32
    %8 = arith.addi %0, %c16_i32_5 : i32
    %c16_i32_6 = arith.constant 16 : i32
    %9 = arith.cmpi slt, %8, %c16_i32_6 : i32
    %cst_7 = arith.constant 0.000000e+00 : f32
    %10 = vector.broadcast %cst_7 : f32 to vector<16x32xf32>
    %11 = arith.select %9, %4, %10 : vector<16x32xf32>
    %c0_8 = arith.constant 0 : index
    %c0_9 = arith.constant 0 : index
    %c0_10 = arith.constant 0 : index
    %12 = vector.load %arg2[%c0_8, %c0_9, %c0_10] : memref<1x256x32xf32, #tpu.memory_space<vmem>>, vector<1x256x32xf32>
    %13 = vector.shape_cast %12 : vector<1x256x32xf32> to vector<256x32xf32>
    %14 = tpu.concatenate %7, %13, %11 in 0 : vector<16x32xf32>, vector<256x32xf32>, vector<16x32xf32> -> vector<288x32xf32>
    %c0_11 = arith.constant 0 : index
    %c0_12 = arith.constant 0 : index
    %15 = vector.load %arg5[%c0_11, %c0_12] : memref<32x128xf32, #tpu.memory_space<vmem>>, vector<32x128xf32>
    %cst_13 = arith.constant dense<0.000000e+00> : vector<288x128xf32>
    %16 = tpu.matmul %14, %15, %cst_13 {dimension_numbers = #tpu.dot_dimension_numbers<[1], [0], [0], [1], [0, 0, 1, 1], [], []>} : vector<288x32xf32>, vector<32x128xf32>, vector<288x128xf32> -> vector<288x128xf32>
    %17 = vector.shape_cast %16 : vector<288x128xf32> to vector<18x16x128xf32>
    %c0_i32_14 = arith.constant 0 : i32
    %18 = arith.cmpi sgt, %0, %c0_i32_14 : i32
    %19 = arith.extui %18 : i1 to i32
    %20 = arith.sitofp %19 : i32 to f32
    %c16_i32_15 = arith.constant 16 : i32
    %21 = arith.addi %0, %c16_i32_15 : i32
    %c16_i32_16 = arith.constant 16 : i32
    %22 = arith.cmpi slt, %21, %c16_i32_16 : i32
    %23 = arith.extui %22 : i1 to i32
    %24 = arith.sitofp %23 : i32 to f32
    %25 = tpu.iota {dimensions = array<i32: 0>} : vector<18x1x1xi32>
    %c0_i32_17 = arith.constant 0 : i32
    %26 = vector.broadcast %c0_i32_17 : i32 to vector<18x1x1xi32>
    %27 = arith.cmpi eq, %25, %26 : vector<18x1x1xi32>
    %c17_i32 = arith.constant 17 : i32
    %28 = vector.broadcast %c17_i32 : i32 to vector<18x1x1xi32>
    %29 = arith.cmpi eq, %25, %28 : vector<18x1x1xi32>
    %cst_18 = arith.constant 1.000000e+00 : f32
    %30 = vector.broadcast %24 : f32 to vector<18x1x1xf32>
    %31 = vector.broadcast %cst_18 : f32 to vector<18x1x1xf32>
    %32 = arith.select %29, %30, %31 : vector<18x1x1xi1>, vector<18x1x1xf32>
    %33 = vector.broadcast %20 : f32 to vector<18x1x1xf32>
    %34 = arith.select %27, %33, %32 : vector<18x1x1xi1>, vector<18x1x1xf32>
    %c0_19 = arith.constant 0 : index
    %c0_20 = arith.constant 0 : index
    %35 = vector.load %arg6[%c0_19, %c0_20] : memref<1x128xf32, #tpu.memory_space<vmem>>, vector<1x128xf32>
    %36 = vector.shape_cast %35 : vector<1x128xf32> to vector<1x1x128xf32>
    %37 = vector.broadcast %36 : vector<1x1x128xf32> to vector<18x1x128xf32>
    %38 = vector.broadcast %34 : vector<18x1x1xf32> to vector<18x1x128xf32>
    %39 = arith.mulf %37, %38 : vector<18x1x128xf32>
    %40 = vector.broadcast %39 : vector<18x1x128xf32> to vector<18x16x128xf32>
    %41 = arith.addf %17, %40 : vector<18x16x128xf32>
    %c1_i32 = arith.constant 1 : i32
    %42 = tpu.dynamic_rotate %41 by %c1_i32 dim 1 : vector<18x16x128xf32>, i32 -> vector<18x16x128xf32>
    %c15_i32 = arith.constant 15 : i32
    %43 = tpu.dynamic_rotate %41 by %c15_i32 dim 1 : vector<18x16x128xf32>, i32 -> vector<18x16x128xf32>
    %44 = tpu.iota {dimensions = array<i32: 1>} : vector<1x16x1xi32>
    %c0_i32_21 = arith.constant 0 : i32
    %45 = vector.broadcast %c0_i32_21 : i32 to vector<1x16x1xi32>
    %46 = arith.cmpi ne, %44, %45 : vector<1x16x1xi32>
    %47 = arith.extui %46 : vector<1x16x1xi1> to vector<1x16x1xi32>
    %48 = arith.sitofp %47 : vector<1x16x1xi32> to vector<1x16x1xf32>
    %c15_i32_22 = arith.constant 15 : i32
    %49 = vector.broadcast %c15_i32_22 : i32 to vector<1x16x1xi32>
    %50 = arith.cmpi ne, %44, %49 : vector<1x16x1xi32>
    %51 = arith.extui %50 : vector<1x16x1xi1> to vector<1x16x1xi32>
    %52 = arith.sitofp %51 : vector<1x16x1xi32> to vector<1x16x1xf32>
    %c0_23 = arith.constant 0 : index
    %c0_24 = arith.constant 0 : index
    %53 = vector.load %arg7[%c0_23, %c0_24] : memref<9x128xf32, #tpu.memory_space<vmem>>, vector<9x128xf32>
    %cst_25 = arith.constant 0.000000e+00 : f32
    %54 = vector.broadcast %cst_25 : f32 to vector<16x16x128xf32>
    %55 = vector.extract_strided_slice %53 {offsets = [0, 0], sizes = [1, 128], strides = [1, 1]} : vector<9x128xf32> to vector<1x128xf32>
    %56 = vector.shape_cast %55 : vector<1x128xf32> to vector<1x1x128xf32>
    %57 = vector.broadcast %56 : vector<1x1x128xf32> to vector<1x16x128xf32>
    %58 = vector.broadcast %48 : vector<1x16x1xf32> to vector<1x16x128xf32>
    %59 = arith.mulf %57, %58 : vector<1x16x128xf32>
    %60 = vector.extract_strided_slice %42 {offsets = [0, 0, 0], sizes = [16, 16, 128], strides = [1, 1, 1]} : vector<18x16x128xf32> to vector<16x16x128xf32>
    %61 = vector.broadcast %59 : vector<1x16x128xf32> to vector<16x16x128xf32>
    %62 = arith.mulf %60, %61 : vector<16x16x128xf32>
    %63 = arith.addf %54, %62 : vector<16x16x128xf32>
    %64 = vector.extract_strided_slice %53 {offsets = [1, 0], sizes = [1, 128], strides = [1, 1]} : vector<9x128xf32> to vector<1x128xf32>
    %65 = vector.shape_cast %64 : vector<1x128xf32> to vector<1x1x128xf32>
    %66 = vector.extract_strided_slice %41 {offsets = [0, 0, 0], sizes = [16, 16, 128], strides = [1, 1, 1]} : vector<18x16x128xf32> to vector<16x16x128xf32>
    %67 = vector.broadcast %65 : vector<1x1x128xf32> to vector<16x16x128xf32>
    %68 = arith.mulf %66, %67 : vector<16x16x128xf32>
    %69 = arith.addf %63, %68 : vector<16x16x128xf32>
    %70 = vector.extract_strided_slice %53 {offsets = [2, 0], sizes = [1, 128], strides = [1, 1]} : vector<9x128xf32> to vector<1x128xf32>
    %71 = vector.shape_cast %70 : vector<1x128xf32> to vector<1x1x128xf32>
    %72 = vector.broadcast %71 : vector<1x1x128xf32> to vector<1x16x128xf32>
    %73 = vector.broadcast %52 : vector<1x16x1xf32> to vector<1x16x128xf32>
    %74 = arith.mulf %72, %73 : vector<1x16x128xf32>
    %75 = vector.extract_strided_slice %43 {offsets = [0, 0, 0], sizes = [16, 16, 128], strides = [1, 1, 1]} : vector<18x16x128xf32> to vector<16x16x128xf32>
    %76 = vector.broadcast %74 : vector<1x16x128xf32> to vector<16x16x128xf32>
    %77 = arith.mulf %75, %76 : vector<16x16x128xf32>
    %78 = arith.addf %69, %77 : vector<16x16x128xf32>
    %79 = vector.extract_strided_slice %53 {offsets = [3, 0], sizes = [1, 128], strides = [1, 1]} : vector<9x128xf32> to vector<1x128xf32>
    %80 = vector.shape_cast %79 : vector<1x128xf32> to vector<1x1x128xf32>
    %81 = vector.broadcast %80 : vector<1x1x128xf32> to vector<1x16x128xf32>
    %82 = vector.broadcast %48 : vector<1x16x1xf32> to vector<1x16x128xf32>
    %83 = arith.mulf %81, %82 : vector<1x16x128xf32>
    %84 = vector.extract_strided_slice %42 {offsets = [1, 0, 0], sizes = [16, 16, 128], strides = [1, 1, 1]} : vector<18x16x128xf32> to vector<16x16x128xf32>
    %85 = vector.broadcast %83 : vector<1x16x128xf32> to vector<16x16x128xf32>
    %86 = arith.mulf %84, %85 : vector<16x16x128xf32>
    %87 = arith.addf %78, %86 : vector<16x16x128xf32>
    %88 = vector.extract_strided_slice %53 {offsets = [4, 0], sizes = [1, 128], strides = [1, 1]} : vector<9x128xf32> to vector<1x128xf32>
    %89 = vector.shape_cast %88 : vector<1x128xf32> to vector<1x1x128xf32>
    %90 = vector.extract_strided_slice %41 {offsets = [1, 0, 0], sizes = [16, 16, 128], strides = [1, 1, 1]} : vector<18x16x128xf32> to vector<16x16x128xf32>
    %91 = vector.broadcast %89 : vector<1x1x128xf32> to vector<16x16x128xf32>
    %92 = arith.mulf %90, %91 : vector<16x16x128xf32>
    %93 = arith.addf %87, %92 : vector<16x16x128xf32>
    %94 = vector.extract_strided_slice %53 {offsets = [5, 0], sizes = [1, 128], strides = [1, 1]} : vector<9x128xf32> to vector<1x128xf32>
    %95 = vector.shape_cast %94 : vector<1x128xf32> to vector<1x1x128xf32>
    %96 = vector.broadcast %95 : vector<1x1x128xf32> to vector<1x16x128xf32>
    %97 = vector.broadcast %52 : vector<1x16x1xf32> to vector<1x16x128xf32>
    %98 = arith.mulf %96, %97 : vector<1x16x128xf32>
    %99 = vector.extract_strided_slice %43 {offsets = [1, 0, 0], sizes = [16, 16, 128], strides = [1, 1, 1]} : vector<18x16x128xf32> to vector<16x16x128xf32>
    %100 = vector.broadcast %98 : vector<1x16x128xf32> to vector<16x16x128xf32>
    %101 = arith.mulf %99, %100 : vector<16x16x128xf32>
    %102 = arith.addf %93, %101 : vector<16x16x128xf32>
    %103 = vector.extract_strided_slice %53 {offsets = [6, 0], sizes = [1, 128], strides = [1, 1]} : vector<9x128xf32> to vector<1x128xf32>
    %104 = vector.shape_cast %103 : vector<1x128xf32> to vector<1x1x128xf32>
    %105 = vector.broadcast %104 : vector<1x1x128xf32> to vector<1x16x128xf32>
    %106 = vector.broadcast %48 : vector<1x16x1xf32> to vector<1x16x128xf32>
    %107 = arith.mulf %105, %106 : vector<1x16x128xf32>
    %108 = vector.extract_strided_slice %42 {offsets = [2, 0, 0], sizes = [16, 16, 128], strides = [1, 1, 1]} : vector<18x16x128xf32> to vector<16x16x128xf32>
    %109 = vector.broadcast %107 : vector<1x16x128xf32> to vector<16x16x128xf32>
    %110 = arith.mulf %108, %109 : vector<16x16x128xf32>
    %111 = arith.addf %102, %110 : vector<16x16x128xf32>
    %112 = vector.extract_strided_slice %53 {offsets = [7, 0], sizes = [1, 128], strides = [1, 1]} : vector<9x128xf32> to vector<1x128xf32>
    %113 = vector.shape_cast %112 : vector<1x128xf32> to vector<1x1x128xf32>
    %114 = vector.extract_strided_slice %41 {offsets = [2, 0, 0], sizes = [16, 16, 128], strides = [1, 1, 1]} : vector<18x16x128xf32> to vector<16x16x128xf32>
    %115 = vector.broadcast %113 : vector<1x1x128xf32> to vector<16x16x128xf32>
    %116 = arith.mulf %114, %115 : vector<16x16x128xf32>
    %117 = arith.addf %111, %116 : vector<16x16x128xf32>
    %118 = vector.extract_strided_slice %53 {offsets = [8, 0], sizes = [1, 128], strides = [1, 1]} : vector<9x128xf32> to vector<1x128xf32>
    %119 = vector.shape_cast %118 : vector<1x128xf32> to vector<1x1x128xf32>
    %120 = vector.broadcast %119 : vector<1x1x128xf32> to vector<1x16x128xf32>
    %121 = vector.broadcast %52 : vector<1x16x1xf32> to vector<1x16x128xf32>
    %122 = arith.mulf %120, %121 : vector<1x16x128xf32>
    %123 = vector.extract_strided_slice %43 {offsets = [2, 0, 0], sizes = [16, 16, 128], strides = [1, 1, 1]} : vector<18x16x128xf32> to vector<16x16x128xf32>
    %124 = vector.broadcast %122 : vector<1x16x128xf32> to vector<16x16x128xf32>
    %125 = arith.mulf %123, %124 : vector<16x16x128xf32>
    %126 = arith.addf %117, %125 : vector<16x16x128xf32>
    %c0_26 = arith.constant 0 : index
    %c0_27 = arith.constant 0 : index
    %127 = vector.load %arg8[%c0_26, %c0_27] : memref<1x128xf32, #tpu.memory_space<vmem>>, vector<1x128xf32>
    %128 = vector.shape_cast %127 : vector<1x128xf32> to vector<1x1x128xf32>
    %129 = vector.broadcast %128 : vector<1x1x128xf32> to vector<16x16x128xf32>
    %130 = arith.addf %126, %129 : vector<16x16x128xf32>
    %131 = vector.shape_cast %130 : vector<16x16x128xf32> to vector<256x128xf32>
    %c0_28 = arith.constant 0 : index
    %c0_29 = arith.constant 0 : index
    %132 = vector.load %arg9[%c0_28, %c0_29] : memref<128x32xf32, #tpu.memory_space<vmem>>, vector<128x32xf32>
    %cst_30 = arith.constant dense<0.000000e+00> : vector<256x32xf32>
    %133 = tpu.matmul %131, %132, %cst_30 {dimension_numbers = #tpu.dot_dimension_numbers<[1], [0], [0], [1], [0, 0, 1, 1], [], []>} : vector<256x128xf32>, vector<128x32xf32>, vector<256x32xf32> -> vector<256x32xf32>
    %c0_31 = arith.constant 0 : index
    %c0_32 = arith.constant 0 : index
    %134 = vector.load %arg10[%c0_31, %c0_32] : memref<1x32xf32, #tpu.memory_space<vmem>>, vector<1x32xf32>
    %135 = vector.broadcast %134 : vector<1x32xf32> to vector<256x32xf32>
    %136 = arith.addf %133, %135 : vector<256x32xf32>
    %c0_33 = arith.constant 0 : index
    %c0_34 = arith.constant 0 : index
    %c0_35 = arith.constant 0 : index
    %137 = vector.load %arg11[%c0_33, %c0_34, %c0_35] : memref<1x256x32xf32, #tpu.memory_space<vmem>>, vector<1x256x32xf32>
    %138 = vector.shape_cast %137 : vector<1x256x32xf32> to vector<256x32xf32>
    %139 = vector.shape_cast %136 : vector<256x32xf32> to vector<1x256x32xf32>
    tpu.vector_store %arg11[%c0_33, %c0_34, %c0_35], %139 {strides = array<i32>} : memref<1x256x32xf32, #tpu.memory_space<vmem>>, vector<1x256x32xf32>,
    return
  }
  func.func @transform_0(%arg0: i32, %arg1: i32) -> (i32, i32, i32) {
    %c0_i32 = arith.constant 0 : i32
    %c0_i32_0 = arith.constant 0 : i32
    return %arg0, %arg1, %c0_i32 : i32, i32, i32
  }
  func.func @transform_1(%arg0: i32, %arg1: i32) -> (i32, i32, i32) {
    %c16_i32 = arith.constant 16 : i32
    %0 = arith.muli %arg1, %c16_i32 : i32
    %c1_i32 = arith.constant 1 : i32
    %1 = arith.subi %0, %c1_i32 : i32
    %c0_i32 = arith.constant 0 : i32
    %2 = arith.maxsi %1, %c0_i32 : i32
    %c0_i32_0 = arith.constant 0 : i32
    %c0_i32_1 = arith.constant 0 : i32
    return %arg0, %2, %c0_i32_0 : i32, i32, i32
  }
  func.func @transform_2(%arg0: i32, %arg1: i32) -> (i32, i32, i32) {
    %c16_i32 = arith.constant 16 : i32
    %0 = arith.muli %arg1, %c16_i32 : i32
    %c16_i32_0 = arith.constant 16 : i32
    %1 = arith.addi %0, %c16_i32_0 : i32
    %c15_i32 = arith.constant 15 : i32
    %2 = arith.minsi %1, %c15_i32 : i32
    %c0_i32 = arith.constant 0 : i32
    %c0_i32_1 = arith.constant 0 : i32
    return %arg0, %2, %c0_i32 : i32, i32, i32
  }
  func.func @transform_3(%arg0: i32, %arg1: i32) -> (i32, i32) {
    %c0_i32 = arith.constant 0 : i32
    %c0_i32_0 = arith.constant 0 : i32
    %c0_i32_1 = arith.constant 0 : i32
    return %c0_i32, %c0_i32_0 : i32, i32
  }
  func.func @transform_4(%arg0: i32, %arg1: i32) -> (i32, i32) {
    %c0_i32 = arith.constant 0 : i32
    %c0_i32_0 = arith.constant 0 : i32
    %c0_i32_1 = arith.constant 0 : i32
    return %c0_i32, %c0_i32_0 : i32, i32
  }
  func.func @transform_5(%arg0: i32, %arg1: i32) -> (i32, i32) {
    %c0_i32 = arith.constant 0 : i32
    %c0_i32_0 = arith.constant 0 : i32
    %c0_i32_1 = arith.constant 0 : i32
    return %c0_i32, %c0_i32_0 : i32, i32
  }
  func.func @transform_6(%arg0: i32, %arg1: i32) -> (i32, i32) {
    %c0_i32 = arith.constant 0 : i32
    %c0_i32_0 = arith.constant 0 : i32
    %c0_i32_1 = arith.constant 0 : i32
    return %c0_i32, %c0_i32_0 : i32, i32
  }
  func.func @transform_7(%arg0: i32, %arg1: i32) -> (i32, i32) {
    %c0_i32 = arith.constant 0 : i32
    %c0_i32_0 = arith.constant 0 : i32
    %c0_i32_1 = arith.constant 0 : i32
    return %c0_i32, %c0_i32_0 : i32, i32
  }
  func.func @transform_8(%arg0: i32, %arg1: i32) -> (i32, i32) {
    %c0_i32 = arith.constant 0 : i32
    %c0_i32_0 = arith.constant 0 : i32
    %c0_i32_1 = arith.constant 0 : i32
    return %c0_i32, %c0_i32_0 : i32, i32
  }
  func.func @transform_9(%arg0: i32, %arg1: i32) -> (i32, i32, i32) {
    %c0_i32 = arith.constant 0 : i32
    %c0_i32_0 = arith.constant 0 : i32
    return %arg0, %arg1, %c0_i32 : i32, i32, i32
  }
}

</mosaic_0001>

<bundles_post_ra>
// kernel: tpu_custom_call.1
= control target key start
LH: loop header
LB: loop body
LE: loop exit
PB: predicated region body
PF: predicated region fallthrough
CT: control target
= control target key end

     0   :  { %s2643_s28 = smov 0   ;;  %s2645_s29 = smov 0   ;;  %s4322_s0 = inlined_call_operand.vmem [shape: f32[2,256,32], index: 0, kind: input, shape index: {}]   ;;  %s4323_s1 = inlined_call_operand.vmem [shape: f32[2,256,32], index: 1, kind: input, shape index: {}]   ;;  %s4324_s2 = inlined_call_operand.vmem [shape: f32[2,256,32], index: 2, kind: input, shape index: {}]   ;;  %s4325_s3 = inlined_call_operand.vmem [shape: f32[32,128], index: 3, kind: input, shape index: {}]   ;;  %s4326_s4 = inlined_call_operand.vmem [shape: f32[1,128], index: 4, kind: input, shape index: {}]   ;;  %s4327_s5 = inlined_call_operand.vmem [shape: f32[9,128], index: 5, kind: input, shape index: {}]   ;;  %s4328_s6 = inlined_call_operand.vmem [shape: f32[1,128], index: 6, kind: input, shape index: {}]   ;;  %s4329_s7 = inlined_call_operand.vmem [shape: f32[128,32], index: 7, kind: input, shape index: {}]   ;;  %s4330_s8 = inlined_call_operand.vmem [shape: f32[1,32], index: 8, kind: input, shape index: {}]   ;;  %s4331_s9 = inlined_call_operand.vmem [shape: f32[2,256,32], index: 9, kind: output, shape index: {}]  }
   0x1   :  { %s2647_s30 = smov 0  }
   0x2 LB: > { %s31_s10 = sadd.s32 1, %s2586_s29  ;;  %p2202_p0 = scmp.ge.s32.totalorder %s2590_s30, 1  ;;  %s2590_s30 = sphi %s2647_s30, %s19_s30   ;;  %s2586_s29 = sphi %s2645_s29, %s4561_s29   ;;  %s2582_s28 = sphi %s2643_s28, %s4560_s28  }
   0x3   : > { %p33_p1 = scmp.ge.s32.totalorder %s31_s10, 2  ;;  %p374_p2 = scmp.lt.s32.totalorder %s2590_s30, 3 }
   0x5   : > { %s4563_s10 = smov (%p33_p1, %s31_s10), 0  ;;  %p375_p3 = pnand %p2202_p0, %p374_p2 }
   0x7   : > { %378 = sbr.rel (%p375_p3) target bundleno = 669 (0x29d), region = 56 }
   0xe   : > { %v550_v0 = vld [vmem:[%s4325_s3] sm:$0xff]  ;;  %v551_v1 = vld [vmem:[%s4325_s3 + $0x8] sm:$0xff]  ;;  %v552_v2 = vld [vmem:[%s4325_s3 + $0x10] sm:$0xff]  ;;  %p445_p4 = scmp.lt.s32.totalorder %s2582_s28, 1  ;;  %v2592_v5 = vmov 0.0   ;;  %vm554_vm0 = vcmask 261120   ;;  %v918_v63 = vlaneseq }
   0xf   : > { %v2485_v3 = vpack.c.bf16 %v551_v1, %v550_v0  ;;  %v553_v4 = vld [vmem:[%s4325_s3 + $0x18] sm:$0xff]  ;;  %2351 = vmatprep.mubr.f32.mxu0 %v2592_v5  ;;  %v1795_v7 = vld [vmem:[%s4329_s7] sm:$0xff]  ;;  %v1796_v8 = vld [vmem:[%s4329_s7 + $0x8] sm:$0xff] }
  0x10   : > { %v2489_v6 = vpack.c.bf16 %v553_v4, %v552_v2  ;;  %s4565_s28 = smov (!%p445_p4, %s2582_s28), 1  ;;  %v2493_v9 = vpack.c.bf16 %v1796_v8, %v1795_v7  ;;  %v1797_v42 = vld [vmem:[%s4329_s7 + $0x10] sm:$0xff]  ;;  %v1798_v43 = vld [vmem:[%s4329_s7 + $0x18] sm:$0xff]  ;;  %v1799_v45 = vld [vmem:[%s4329_s7 + $0x20] sm:$0xff]  ;;  %v2799_v0 = vshrl.u32 %v918_v63, 7 }
  0x11   : > { %2486 = vmatprep.subr.bf16.mxu0 %v2485_v3  ;;  %s2250_s23 = sshll.u32 %s4565_s28, 8  ;;  %v2497_v44 = vpack.c.bf16 %v1798_v43, %v1797_v42  ;;  %v1800_v46 = vld [vmem:[%s4329_s7 + $0x28] sm:$0xff]  ;;  %v1801_v48 = vld [vmem:[%s4329_s7 + $0x30] sm:$0xff]  ;;  %v1802_v49 = vld [vmem:[%s4329_s7 + $0x38] sm:$0xff] }
  0x12   : > { %2488 = vmatpush3.bf16.msra.mxu0 %v2485_v3  ;;  %2525 = vmatprep.subr.bf16.mxu1 %v2493_v9  ;;  %s2688_s26 = scalar_lea.vmem %s4322_s0, %s2250_s23  ;;  %v2501_v47 = vpack.c.bf16 %v1800_v46, %v1799_v45  ;;  %v2505_v50 = vpack.c.bf16 %v1802_v49, %v1801_v48  ;;  %v1803_v51 = vld [vmem:[%s4329_s7 + $0x40] sm:$0xff]  ;;  %v1804_v52 = vld [vmem:[%s4329_s7 + $0x48] sm:$0xff]  ;;  %v1805_v54 = vld [vmem:[%s4329_s7 + $0x50] sm:$0xff]  ;;  %v920_v3 = vsub.s32 0, %v2799_v0  ;;  %v1117_v4 = vadd.s32 8, %v2799_v0  ;;  %s4215_s16 = scalar_lea.vmem %s4331_s9, %s2250_s23 }
  0x13   : > { %2490 = vmatprep.subr.bf16.mxu0 %v2489_v6  ;;  %2533 = vmatpush3.bf16.msra.mxu1 %v2493_v9  ;;  %v518_v10 = vld [vmem:[%s2688_s26] sm:$0xff]  ;;  %v519_v11 = vld [vmem:[%s2688_s26 + $0x8] sm:$0xff]  ;;  %v520_v12 = vld [vmem:[%s2688_s26 + $0x10] sm:$0xff]  ;;  %v2509_v53 = vpack.c.bf16 %v1804_v52, %v1803_v51  ;;  %vm1118_vm1 = vcmp.ne.s32.totalorder %v2799_v0, 0  ;;  %vm1007_vm3 = vcmp.lt.s32.totalorder %v2799_v0, 1  ;;  %vm1080_vm4 = vcmp.lt.s32.totalorder %v2799_v0, 7 }
  0x14   : > { %v521_v13 = vld [vmem:[%s2688_s26 + $0x18] sm:$0xff]  ;;  %v522_v14 = vld [vmem:[%s2688_s26 + $0x20] sm:$0xff]  ;;  %v523_v15 = vld [vmem:[%s2688_s26 + $0x28] sm:$0xff]  ;;  %2526 = vmatprep.subr.bf16.mxu1 %v2497_v44  ;;  %vm1125_vm2 = vcmp.ne.s32.totalorder %v1117_v4, 15 }
  0x15   : > { %v524_v16 = vld [vmem:[%s2688_s26 + $0x30] sm:$0xff]  ;;  %v525_v17 = vld [vmem:[%s2688_s26 + $0x38] sm:$0xff]  ;;  %v526_v18 = vld [vmem:[%s2688_s26 + $0x40] sm:$0xff] }
  0x16   : > { %2492 = vmatpush3.bf16.msra.mxu0 %v2489_v6  ;;  %v527_v19 = vld [vmem:[%s2688_s26 + $0x48] sm:$0xff]  ;;  %v528_v20 = vld [vmem:[%s2688_s26 + $0x50] sm:$0xff]  ;;  %v529_v21 = vld [vmem:[%s2688_s26 + $0x58] sm:$0xff]  ;;  %v1272_v6 = vsub.s32 2, %v2799_v0 }
  0x17   : > { %2494 = vmatprep.subr.bf16.mxu0 %v2493_v9  ;;  %v530_v22 = vld [vmem:[%s2688_s26 + $0x60] sm:$0xff]  ;;  %v531_v23 = vld [vmem:[%s2688_s26 + $0x68] sm:$0xff]  ;;  %v532_v24 = vld [vmem:[%s2688_s26 + $0x70] sm:$0xff]  ;;  %2534 = vmatpush3.bf16.msra.mxu1 %v2497_v44 }
  0x18   : > { %v533_v25 = vld [vmem:[%s2688_s26 + $0x78] sm:$0xff]  ;;  %v534_v26 = vld [vmem:[%s2688_s26 + $0x80] sm:$0xff]  ;;  %v535_v27 = vld [vmem:[%s2688_s26 + $0x88] sm:$0xff]  ;;  %2527 = vmatprep.subr.bf16.mxu1 %v2501_v47 }
  0x19   : > { %2352 = vmatmul.mubr.f32.vlgmr.msra.gmra.mrb[0].mxu0 %v2592_v5  ;;  %v536_v28 = vld [vmem:[%s2688_s26 + $0x90] sm:$0xff]  ;;  %v537_v29 = vld [vmem:[%s2688_s26 + $0x98] sm:$0xff]  ;;  %v538_v30 = vld [vmem:[%s2688_s26 + $0xa0] sm:$0xff] }
  0x1a   : > { %2354 = vmatprep.mubr.msk.f32.mxu0 %vm554_vm0, %v518_v10  ;;  %2496 = vmatpush3.bf16.msra.mxu0 %v2493_v9  ;;  %v539_v31 = vld [vmem:[%s2688_s26 + $0xa8] sm:$0xff]  ;;  %v540_v32 = vld [vmem:[%s2688_s26 + $0xb0] sm:$0xff]  ;;  %v541_v33 = vld [vmem:[%s2688_s26 + $0xb8] sm:$0xff]  ;;  %v1204_v9 = vsub.s32 1, %v2799_v0 }
  0x1b   : > { %v542_v34 = vld [vmem:[%s2688_s26 + $0xc0] sm:$0xff]  ;;  %v543_v35 = vld [vmem:[%s2688_s26 + $0xc8] sm:$0xff]  ;;  %v544_v36 = vld [vmem:[%s2688_s26 + $0xd0] sm:$0xff]  ;;  %2498 = vmatprep.subr.bf16.mxu0 %v2497_v44  ;;  %2535 = vmatpush3.bf16.msra.mxu1 %v2501_v47 }
  0x1c   : > { %v545_v37 = vld [vmem:[%s2688_s26 + $0xd8] sm:$0xff]  ;;  %v546_v38 = vld [vmem:[%s2688_s26 + $0xe0] sm:$0xff]  ;;  %v547_v39 = vld [vmem:[%s2688_s26 + $0xe8] sm:$0xff]  ;;  %2528 = vmatprep.subr.bf16.mxu1 %v2505_v50 }
  0x1d   : > { %2355 = vmatmul.mubr.msk.f32.gmra.mrb[2].mxu0 %vm554_vm0, %v519_v11  ;;  %v548_v40 = vld [vmem:[%s2688_s26 + $0xf0] sm:$0xff]  ;;  %v549_v41 = vld [vmem:[%s2688_s26 + $0xf8] sm:$0xff]  ;;  %v1807_v57 = vld [vmem:[%s4329_s7 + $0x60] sm:$0xff]  ;;  %v2820_v11 = vsel %vm1118_vm1, 1.0, %v2592_v5 }
  0x1e   : > { %2357 = vmatprep.mubr.msk.f32.mxu0 %vm554_vm0, %v520_v12  ;;  %2500 = vmatpush3.bf16.msra.mxu0 %v2497_v44  ;;  %v1806_v55 = vld [vmem:[%s4329_s7 + $0x58] sm:$0xff]  ;;  %v1808_v58 = vld [vmem:[%s4329_s7 + $0x68] sm:$0xff]  ;;  %v1809_v60 = vld [vmem:[%s4329_s7 + $0x70] sm:$0xff] }
  0x1f   : > { %2502 = vmatprep.subr.bf16.mxu0 %v2501_v47  ;;  %2536 = vmatpush3.bf16.msra.mxu1 %v2505_v50  ;;  %v2513_v56 = vpack.c.bf16 %v1806_v55, %v1805_v54  ;;  %v2517_v59 = vpack.c.bf16 %v1808_v58, %v1807_v57  ;;  %v1810_v61 = vld [vmem:[%s4329_s7 + $0x78] sm:$0xff]  ;;  %v912_v1 = vld [vmem:[%s4326_s4] sm:$0x1]  ;;  %v1620_v54 = vsub.s32 7, %v2799_v0 }
  0x20   : > { %2529 = vmatprep.subr.bf16.mxu1 %v2509_v53  ;;  %v2521_v62 = vpack.c.bf16 %v1810_v61, %v1809_v60  ;;  %v913_v2 = vmul.f32 0.0, %v912_v1  ;;  %v2813_v8 = vld [vmem:[%s4327_s5] sm:$0xff] }
  0x21   : > { %2358 = vmatmul.mubr.msk.f32.gmra.mrb[4].mxu0 %vm554_vm0, %v521_v13  ;;  %v2817_v10 = vrot.slane %v2813_v8, %v920_v3  ;;  %v2823_v12 = vrot.slane %v2813_v8, %v1272_v6  ;;  %v1342_v13 = vsub.s32 3, %v2799_v0 }
  0x22   : > { %2360 = vmatprep.mubr.msk.f32.mxu0 %vm554_vm0, %v522_v14  ;;  %2504 = vmatpush3.bf16.msra.mxu0 %v2501_v47  ;;  %v2808_v7 = vrot.slane %v913_v2, %v920_v3 }
  0x23   : > { %2506 = vmatprep.subr.bf16.mxu0 %v2505_v50  ;;  %2537 = vmatpush3.bf16.msra.mxu1 %v2509_v53 }
  0x24   : > { %2530 = vmatprep.subr.bf16.mxu1 %v2513_v56  ;;  %4356 = vst [vmem:[#allocation2_spill] sm:$0xff] %v2808_v7 }
  0x25   : > { %2361 = vmatmul.mubr.msk.f32.gmra.mrb[6].mxu0 %vm554_vm0, %v523_v15  ;;  %v2827_v15 = vsel %vm1125_vm2, 1.0, %v2592_v5 }
  0x26   : > { %2363 = vmatprep.mubr.msk.f32.mxu0 %vm554_vm0, %v524_v16  ;;  %2508 = vmatpush3.bf16.msra.mxu0 %v2505_v50  ;;  %v1412_v16 = vsub.s32 4, %v2799_v0 }
  0x27   : > { %2510 = vmatprep.subr.bf16.mxu0 %v2509_v53  ;;  %2538 = vmatpush3.bf16.msra.mxu1 %v2513_v56 }
  0x28   : > { %2531 = vmatprep.subr.bf16.mxu1 %v2517_v59 }
  0x29   : > { %2364 = vmatmul.mubr.msk.f32.gmra.mrb[8].mxu0 %vm554_vm0, %v525_v17  ;;  %v2830_v17 = vrot.slane %v912_v1, %v920_v3 }
  0x2a   : > { %2366 = vmatprep.mubr.msk.f32.mxu0 %vm554_vm0, %v526_v18  ;;  %2512 = vmatpush3.bf16.msra.mxu0 %v2509_v53 }
  0x2b   : > { %2514 = vmatprep.subr.bf16.mxu0 %v2513_v56  ;;  %2539 = vmatpush3.bf16.msra.mxu1 %v2517_v59 }
  0x2c   : > { %2532 = vmatprep.subr.bf16.mxu1 %v2521_v62 }
  0x2d   : > { %2367 = vmatmul.mubr.msk.f32.gmra.mrb[10].mxu0 %vm554_vm0, %v527_v19 }
  0x2e   : > { %2369 = vmatprep.mubr.msk.f32.mxu0 %vm554_vm0, %v528_v20  ;;  %2516 = vmatpush3.bf16.msra.mxu0 %v2513_v56 }
  0x2f   : > { %2518 = vmatprep.subr.bf16.mxu0 %v2517_v59  ;;  %2540 = vmatpush3.bf16.msra.mxu1 %v2521_v62 }
  0x31   : > { %2370 = vmatmul.mubr.msk.f32.gmra.mrb[12].mxu0 %vm554_vm0, %v529_v21  ;;  %v2837_v21 = vrot.slane %v2813_v8, %v1204_v9 }
  0x32   : > { %2372 = vmatprep.mubr.msk.f32.mxu0 %vm554_vm0, %v530_v22  ;;  %2520 = vmatpush3.bf16.msra.mxu0 %v2517_v59 }
  0x33   : > { %2522 = vmatprep.subr.bf16.mxu0 %v2521_v62 }
  0x35   : > { %2373 = vmatmul.mubr.msk.f32.gmra.mrb[14].mxu0 %vm554_vm0, %v531_v23 }
  0x36   : > { %2375 = vmatprep.mubr.msk.f32.mxu0 %vm554_vm0, %v532_v24  ;;  %2524 = vmatpush3.bf16.msra.mxu0 %v2521_v62  ;;  %v2845_v24 = vmul.f32 %v2827_v15, %v2823_v12 }
  0x39   : > { %2376 = vmatmul.mubr.msk.f32.gmra.mrb[16].mxu0 %vm554_vm0, %v533_v25  ;;  %v1480_v25 = vsub.s32 5, %v2799_v0 }
  0x3a   : > { %2378 = vmatprep.mubr.msk.f32.mxu0 %vm554_vm0, %v534_v26 }
  0x3b   : > { %v2869_v42 = vrot.slane %v2813_v8, %v1480_v25 }
  0x3d   : > { %2379 = vmatmul.mubr.msk.f32.gmra.mrb[18].mxu0 %vm554_vm0, %v535_v27  ;;  %v2887_v60 = vmul.f32 %v2827_v15, %v2869_v42 }
  0x3e   : > { %2381 = vmatprep.mubr.msk.f32.mxu0 %vm554_vm0, %v536_v28 }
  0x41   : > { %2382 = vmatmul.mubr.msk.f32.gmra.mrb[20].mxu0 %vm554_vm0, %v537_v29  ;;  %v2849_v29 = vrot.slane %v2813_v8, %v1342_v13 }
  0x42   : > { %2384 = vmatprep.mubr.msk.f32.mxu0 %vm554_vm0, %v538_v30  ;;  %v2852_v30 = vrot.slane %v2813_v8, %v1412_v16 }
  0x43   : > { %v2876_v52 = vmul.f32 %v2820_v11, %v2849_v29 }
  0x45   : > { %2385 = vmatmul.mubr.msk.f32.gmra.mrb[22].mxu0 %vm554_vm0, %v539_v31  ;;  %v1550_v31 = vsub.s32 6, %v2799_v0 }
  0x46   : > { %2387 = vmatprep.mubr.msk.f32.mxu0 %vm554_vm0, %v540_v32 }
  0x47   : > { %v2879_v53 = vrot.slane %v2813_v8, %v1550_v31 }
  0x49   : > { %2388 = vmatmul.mubr.msk.f32.gmra.mrb[24].mxu0 %vm554_vm0, %v541_v33 }
  0x4a   : > { %2390 = vmatprep.mubr.msk.f32.mxu0 %vm554_vm0, %v542_v34 }
  0x4d   : > { %2391 = vmatmul.mubr.msk.f32.gmra.mrb[26].mxu0 %vm554_vm0, %v543_v35 }
  0x4e   : > { %2393 = vmatprep.mubr.msk.f32.mxu0 %vm554_vm0, %v544_v36 }
  0x51   : > { %2394 = vmatmul.mubr.msk.f32.gmra.mrb[28].mxu0 %vm554_vm0, %v545_v37 }
  0x52   : > { %2396 = vmatprep.mubr.msk.f32.mxu0 %vm554_vm0, %v546_v38 }
  0x55   : > { %2397 = vmatmul.mubr.msk.f32.gmra.mrb[30].mxu0 %vm554_vm0, %v547_v39 }
  0x56   : > { %2399 = vmatprep.mubr.msk.f32.mxu0 %vm554_vm0, %v548_v40 }
  0x59   : > { %2400 = vmatmul.mubr.msk.f32.gmra.mrb[32].mxu0 %vm554_vm0, %v549_v41 }
  0x5a   : > { %2402 = vmatprep.mubr.f32.mxu0 %v2592_v5 }
  0x5d   : > { %2403 = vmatmul.mubr.f32.gmra.mrb[34].mxu0 %v2592_v5  ;;  %v2841_v5 = vmul.f32 %v2820_v11, %v2817_v10 }
  0xec   : > { %v2353_v14 = vpop.f32.mrb[0].mxu0 }
  0xed   : > { %v934_v18 = vadd.f32 %v2353_v14, %v2808_v7  ;;  %v729_v19 = vpop.f32.mrb[1].mxu0 }
  0xee   : > { %v933_v20 = vadd.f32 %v2808_v7, %v729_v19 }
  0xef   : > { %v987_v22 = vrot.slane %v934_v18, 7  ;;  %v1062_v23 = vrot.slane %v934_v18, 1  ;;  %v1207_v38 = vmul.f32 %v2837_v21, %v934_v18 }
  0xf0   : > { %v969_v26 = vrot.slane %v933_v20, 7  ;;  %v1044_v27 = vrot.slane %v933_v20, 1  ;;  %v2356_v28 = vpop.f32.mrb[2].mxu0  ;;  %v1206_v41 = vmul.f32 %v2837_v21, %v933_v20 }
  0xf1   : > { %v936_v32 = vadd.f32 %v2356_v28, %v2830_v17  ;;  %v739_v33 = vpop.f32.mrb[3].mxu0 }
  0xf2   : > { %v1008_v34 = vsel %vm1007_vm3, %v969_v26, %v987_v22  ;;  %v1026_v35 = vsel %vm1007_vm3, %v987_v22, %v969_v26  ;;  %v1081_v36 = vsel %vm1080_vm4, %v1044_v27, %v1062_v23  ;;  %v1099_v37 = vsel %vm1080_vm4, %v1062_v23, %v1044_v27 }
  0xf3   : > { %v1138_v39 = vmul.f32 %v2841_v5, %v1026_v35  ;;  %v1139_v40 = vmul.f32 %v2817_v10, %v1008_v34  ;;  %v1276_v43 = vmul.f32 %v2823_v12, %v1081_v36  ;;  %v1277_v44 = vmul.f32 %v2845_v24, %v1099_v37 }
  0xf4   : > { %v988_v45 = vrot.slane %v936_v32, 7  ;;  %v2359_v46 = vpop.f32.mrb[4].mxu0  ;;  %v1063_v49 = vrot.slane %v936_v32, 1  ;;  %v935_v50 = vadd.f32 %v2830_v17, %v739_v33  ;;  %v1209_v61 = vmul.f32 %v2837_v21, %v936_v32 }
  0xf5   : > { %v1238_v47 = vadd.f32 %v1206_v41, %v1138_v39  ;;  %v1239_v48 = vadd.f32 %v1207_v38, %v1139_v40  ;;  %v749_v51 = vpop.f32.mrb[5].mxu0  ;;  %v2883_v55 = vadd.f32 %v2359_v46, %v2830_v17  ;;  %v1415_v62 = vmul.f32 %v2852_v30, %v936_v32  ;;  %v2918_v32 = vld [vmem:[%s4327_s5 + $0x8] ss:$0 sm:$0xff] }
  0xf6   : > { %v970_v58 = vrot.slane %v935_v50, 7  ;;  %v1045_v59 = vrot.slane %v935_v50, 1  ;;  %v2892_v63 = vadd.f32 %v2830_v17, %v749_v51  ;;  %v1208_v16 = vmul.f32 %v2837_v21, %v935_v50 }
  0xf7   : > { %v1308_v56 = vadd.f32 %v1276_v43, %v1238_v47  ;;  %v1309_v57 = vadd.f32 %v1277_v44, %v1239_v48  ;;  %v1414_v18 = vmul.f32 %v2852_v30, %v935_v50  ;;  %v989_v22 = vrot.slane %v2883_v55, 7 }
  0xf8   : > { %v2362_v1 = vpop.f32.mrb[6].mxu0  ;;  %v1009_v2 = vsel %vm1007_vm3, %v970_v58, %v988_v45  ;;  %v1027_v3 = vsel %vm1007_vm3, %v988_v45, %v970_v58  ;;  %v2900_v4 = vsel %vm1080_vm4, %v1045_v59, %v1063_v49  ;;  %v1100_v6 = vsel %vm1080_vm4, %v1063_v49, %v1045_v59 }
  0xf9   : > { %v759_v9 = vpop.f32.mrb[7].mxu0  ;;  %v1140_v13 = vmul.f32 %v2841_v5, %v1027_v3  ;;  %v1141_v14 = vmul.f32 %v2817_v10, %v1009_v2  ;;  %v1346_v19 = vmul.f32 %v2876_v52, %v1027_v3  ;;  %v1347_v20 = vmul.f32 %v2849_v29, %v1009_v2 }
  0xfa   : > { %v1064_v23 = vrot.slane %v2883_v55, 1  ;;  %v1278_v27 = vmul.f32 %v2823_v12, %v2900_v4  ;;  %v1279_v28 = vmul.f32 %v2845_v24, %v1100_v6  ;;  %v971_v35 = vrot.slane %v2892_v63, 7 }
  0xfb   : > { %v1240_v25 = vadd.f32 %v1208_v16, %v1140_v13  ;;  %v1241_v26 = vadd.f32 %v1209_v61, %v1141_v14  ;;  %v1378_v33 = vadd.f32 %v1346_v19, %v1308_v56  ;;  %v1379_v34 = vadd.f32 %v1347_v20, %v1309_v57 }
  0xfc   : > { %v2365_v31 = vpop.f32.mrb[8].mxu0  ;;  %v1046_v36 = vrot.slane %v2892_v63, 1  ;;  %v2923_v38 = vrot.slane %v2813_v8, %v1620_v54  ;;  %v1485_v41 = vmul.f32 %v2887_v60, %v1100_v6  ;;  %v2932_v45 = vsel %vm1007_vm3, %v971_v35, %v989_v22 }
  0xfd   : > { %v769_v37 = vpop.f32.mrb[9].mxu0  ;;  %v2925_v39 = vadd.f32 %v1278_v27, %v1240_v25  ;;  %v2927_v40 = vadd.f32 %v1279_v28, %v1241_v26  ;;  %v1446_v43 = vadd.f32 %v1414_v18, %v1378_v33  ;;  %v1447_v44 = vadd.f32 %v1415_v62, %v1379_v34 }
  0xfe   : > { %v2936_v46 = vsel %vm1080_vm4, %v1064_v23, %v1046_v36  ;;  %v2940_v8 = vmul.f32 %v2820_v11, %v2879_v53  ;;  %v2944_v47 = vmul.f32 %v2918_v32, %v2827_v15  ;;  %v2947_v48 = vadd.f32 %v2362_v1, %v2830_v17 }
  0xff   : > { %v1517_v50 = vadd.f32 %v1485_v41, %v1447_v44  ;;  %v2951_v51 = vmul.f32 %v2837_v21, %v2883_v55  ;;  %v2955_v54 = vmul.f32 %v2852_v30, %v2883_v55  ;;  %v2958_v11 = vadd.f32 %v2830_v17, %v759_v9 }
 0x100   : > { %v2368_v49 = vpop.f32.mrb[10].mxu0  ;;  %v2962_v15 = vmul.f32 %v2923_v38, %v2883_v55  ;;  %v2966_v57 = vmul.f32 %v2837_v21, %v2892_v63  ;;  %v2970_v58 = vmul.f32 %v2852_v30, %v2892_v63  ;;  %v2973_v59 = vadd.f32 %v2365_v31, %v2830_v17 }
 0x101   : > { %v779_v56 = vpop.f32.mrb[11].mxu0  ;;  %v2977_v61 = vmul.f32 %v2817_v10, %v2932_v45  ;;  %v2981_v62 = vmul.f32 %v2845_v24, %v2936_v46  ;;  %v1555_v55 = vmul.f32 %v2879_v53, %v2932_v45  ;;  %v2986_v1 = vadd.f32 %v2830_v17, %v769_v37 }
 0x102   : > { %v2992_v6 = vmul.f32 %v2837_v21, %v2947_v48  ;;  %v2996_v9 = vmul.f32 %v2852_v30, %v2947_v48  ;;  %v3002_v18 = vmul.f32 %v2837_v21, %v2958_v11  ;;  %v3005_v19 = vadd.f32 %v2368_v49, %v2830_v17 }
 0x103   : > { %v3009_v26 = vadd.f32 %v2830_v17, %v779_v56  ;;  %v1028_v27 = vsel %vm1007_vm3, %v989_v22, %v971_v35  ;;  %v1083_v28 = vsel %vm1080_vm4, %v1046_v36, %v1064_v23  ;;  %v3017_v31 = vmul.f32 %v2837_v21, %v2973_v59 }
 0x104   : > { %4357 = vst [vmem:[#allocation3_spill] sm:$0xff] %v2996_v9  ;;  %v2371_v13 = vpop.f32.mrb[12].mxu0  ;;  %v3021_v33 = vmul.f32 %v2852_v30, %v2973_v59  ;;  %v3029_v41 = vmul.f32 %v2837_v21, %v2986_v1  ;;  %v3033_v22 = vmul.f32 %v2852_v30, %v2986_v1  ;;  %v1484_v35 = vmul.f32 %v2869_v42, %v2900_v4 }
 0x105   : > { %v789_v20 = vpop.f32.mrb[13].mxu0  ;;  %v3025_v37 = vadd.f32 %v2371_v13, %v2830_v17  ;;  %v3044_v56 = vmul.f32 %v2837_v21, %v3005_v19  ;;  %v3048_v13 = vmul.f32 %v2852_v30, %v3005_v19  ;;  %v3054_v4 = vmul.f32 %v2837_v21, %v3009_v26 }
 0x106   : > { %4358 = vst [vmem:[#allocation4_spill] sm:$0xff] %v3021_v33  ;;  %v3036_v23 = vadd.f32 %v2830_v17, %v789_v20  ;;  %v3058_v49 = vmul.f32 %v2852_v30, %v3009_v26  ;;  %v1348_v20 = vmul.f32 %v2876_v52, %v1028_v27  ;;  %v1516_v14 = vadd.f32 %v1484_v35, %v1446_v43 }
 0x107   : > { %4359 = vst [vmem:[#allocation5_spill] sm:$0xff] %v3025_v37  ;;  %4361 = vst [vmem:[#allocation7_spill] sm:$0xff] %v3044_v56  ;;  %v3064_v3 = vmul.f32 %v2837_v21, %v3025_v37  ;;  %v3069_v34 = vmul.f32 %v2852_v30, %v3025_v37  ;;  %v1554_v7 = vmul.f32 %v2940_v8, %v1028_v27  ;;  %v4369_v2 = vrot.slane %v2947_v48, 7 }
 0x108   : > { %4360 = vst [vmem:[#allocation6_spill] sm:$0xff] %v3036_v23  ;;  %v2374_v36 = vpop.f32.mrb[14].mxu0  ;;  %4362 = vst [vmem:[#allocation8_spill] sm:$0xff] %v3048_v13  ;;  %v1622_v16 = vmul.f32 %v2923_v38, %v2892_v63  ;;  %v4370_v35 = vrot.slane %v2947_v48, 1  ;;  %v4371_v44 = vrot.slane %v2958_v11, 1 }
 0x109   : > { %v799_v25 = vpop.f32.mrb[15].mxu0  ;;  %4363 = vst [vmem:[#allocation9_spill] sm:$0xff] %v3054_v4  ;;  %4364 = vst [vmem:[#allocation10_spill] sm:$0xff] %v3058_v49  ;;  %v3077_v49 = vadd.f32 %v2374_v36, %v2830_v17  ;;  %v1586_v56 = vadd.f32 %v1554_v7, %v1516_v14  ;;  %v3100_v7 = vmul.f32 %v2837_v21, %v3036_v23 }
 0x10a   : > { %4365 = vst [vmem:[#allocation11_spill] sm:$0xff] %v3064_v3  ;;  %4366 = vst [vmem:[#allocation12_spill] sm:$0xff] %v3069_v34  ;;  %v1587_v3 = vadd.f32 %v1555_v55, %v1517_v50  ;;  %v4368_v34 = vrot.slane %v2958_v11, 7  ;;  %v3095_v63 = vsel %vm1080_vm4, %v4371_v44, %v4370_v35  ;;  %v1380_v50 = vadd.f32 %v1348_v20, %v2925_v39 }
 0x10b   : > { %4367 = vst [vmem:[#allocation13_spill] sm:$0xff] %v3077_v49  ;;  %4372 = vst [vmem:[#allocation14_spill] sm:$0xff] %v3100_v7  ;;  %v3104_v55 = vmul.f32 %v2852_v30, %v3036_v23  ;;  %v3110_v14 = vmul.f32 %v2823_v12, %v1083_v28  ;;  %v1692_v36 = vmul.f32 %v2918_v32, %v1083_v28 }
 0x10c   : > { %v2377_v13 = vpop.f32.mrb[16].mxu0  ;;  %v3087_v43 = vsel %vm1007_vm3, %v4369_v2, %v4368_v34  ;;  %v3107_v2 = vmul.f32 %v2841_v5, %v1028_v27  ;;  %v1654_v34 = vadd.f32 %v1622_v16, %v1586_v56  ;;  %v1655_v44 = vadd.f32 %v2962_v15, %v1587_v3  ;;  %v3122_v27 = vld [vmem:[%s4328_s6] ss:$0 sm:$0xff] }
 0x10d   : > { %v3079_v33 = vpop.f32.mrb[17].mxu0  ;;  %4373 = vst [vmem:[#allocation15_spill] sm:$0xff] %v3104_v55  ;;  %v1693_v39 = vmul.f32 %v2944_v47, %v2936_v46  ;;  %v1486_v35 = vmul.f32 %v2869_v42, %v1083_v28  ;;  %v3126_v16 = vadd.f32 %v2830_v17, %v799_v25  ;;  %v1144_v15 = vmul.f32 %v2841_v5, %v3087_v43 }
 0x10e   : > { %v1724_v56 = vadd.f32 %v1692_v36, %v1654_v34  ;;  %v1448_v28 = vadd.f32 %v2970_v58, %v1380_v50  ;;  %v3136_v23 = vmul.f32 %v2837_v21, %v3077_v49  ;;  %v1282_v25 = vmul.f32 %v2823_v12, %v3095_v63 }
 0x10f   : > { %4374 = vst [vmem:[#allocation16_spill] sm:$0xff] %v3126_v16  ;;  %v1725_v37 = vadd.f32 %v1693_v39, %v1655_v44  ;;  %v1244_v55 = vadd.f32 %v3002_v18, %v1144_v15  ;;  %v1556_v9 = vmul.f32 %v2940_v8, %v3087_v43  ;;  %v4376_v44 = vrot.slane %v2947_v48, 7 }
 0x110   : > { %v3116_v20 = vpop.f32.mrb[18].mxu0  ;;  %4375 = vst [vmem:[#allocation17_spill] sm:$0xff] %v3136_v23  ;;  %v1763_v4 = vadd.f32 %v3122_v27, %v1724_v56  ;;  %v1518_v36 = vadd.f32 %v1486_v35, %v1448_v28  ;;  %v4377_v58 = vrot.slane %v2958_v11, 7  ;;  %v3155_v18 = vmul.f32 %v2852_v30, %v3077_v49 }
 0x111   : > { %v3130_v3 = vpop.f32.mrb[19].mxu0  ;;  %v1764_v34 = vadd.f32 %v3122_v27, %v1725_v37  ;;  %v1314_v7 = vadd.f32 %v1282_v25, %v1244_v55  ;;  %v3159_v56 = vadd.f32 %v2377_v13, %v2830_v17  ;;  %v1624_v28 = vmul.f32 %v2923_v38, %v2958_v11 }
 0x112   : > { %v1011_v50 = vsel %vm1007_vm3, %v4377_v58, %v4376_v44  ;;  %4378 = vst [vmem:[#allocation18_spill] sm:$0xff] %v3155_v18  ;;  %2437 = vmatprep.mubr.f32.mxu0 %v1763_v4  ;;  %v1588_v35 = vadd.f32 %v1556_v9, %v1518_v36  ;;  %v4380_v44 = vrot.slane %v2958_v11, 1  ;;  %v4381_v58 = vrot.slane %v2947_v48, 1 }
 0x113   : > { %4379 = vst [vmem:[#allocation19_spill] sm:$0xff] %v3159_v56  ;;  %v1145_v15 = vmul.f32 %v2817_v10, %v1011_v50  ;;  %2438 = vmatmul.mubr.f32.vlgmr.msra.gmra.mrb[36].mxu0 %v1764_v34  ;;  %v3175_v55 = vmul.f32 %v2837_v21, %v3126_v16  ;;  %v3179_v9 = vmul.f32 %v2852_v30, %v3126_v16  ;;  %v4388_v23 = vrot.slane %v3009_v26, 7 }
 0x114   : > { %v3151_v39 = vpop.f32.mrb[20].mxu0  ;;  %v1102_v18 = vsel %vm1080_vm4, %v4381_v58, %v4380_v44  ;;  %v1349_v4 = vmul.f32 %v2849_v29, %v2932_v45  ;;  %v1656_v25 = vadd.f32 %v1624_v28, %v1588_v35  ;;  %v1694_v36 = vmul.f32 %v2918_v32, %v3095_v63 }
 0x115   : > { %v3161_v37 = vpop.f32.mrb[21].mxu0  ;;  %4382 = vst [vmem:[#allocation20_spill] sm:$0xff] %v3175_v55  ;;  %4383 = vst [vmem:[#allocation21_spill] sm:$0xff] %v3179_v9  ;;  %v1245_v44 = vadd.f32 %v2992_v6, %v1145_v15  ;;  %v1283_v34 = vmul.f32 %v2845_v24, %v1102_v18  ;;  %v3193_v9 = vmul.f32 %v2837_v21, %v3159_v56  ;;  %v4386_v6 = vrot.slane %v2986_v1, 7 }
 0x116   : > { %v1381_v45 = vadd.f32 %v1349_v4, %v2927_v40  ;;  %v1726_v28 = vadd.f32 %v1694_v36, %v1656_v25  ;;  %v4387_v15 = vrot.slane %v2973_v59, 7  ;;  %v4389_v49 = vrot.slane %v3005_v19, 7 }
 0x117   : > { %4384 = vst [vmem:[#allocation22_spill] sm:$0xff] %v3193_v9  ;;  %v3198_v55 = vadd.f32 %v1283_v34, %v1245_v44  ;;  %v3216_v40 = vmul.f32 %v2852_v30, %v3159_v56  ;;  %v3219_v4 = vmul.f32 %v2849_v29, %v1011_v50  ;;  %v1487_v36 = vmul.f32 %v2887_v60, %v2936_v46 }
 0x118   : > { %v3187_v58 = vpop.f32.mrb[22].mxu0  ;;  %v1030_v13 = vsel %vm1007_vm3, %v4387_v15, %v4386_v6  ;;  %v3212_v9 = vsel %vm1007_vm3, %v4389_v49, %v4388_v23  ;;  %v1449_v25 = vadd.f32 %v2955_v54, %v1381_v45  ;;  %v1765_v44 = vadd.f32 %v3122_v27, %v1726_v28 }
 0x119   : > { %v3196_v35 = vpop.f32.mrb[23].mxu0  ;;  %4390 = vst [vmem:[#allocation24_spill] sm:$0xff] %v3216_v40  ;;  %v1557_v34 = vmul.f32 %v2879_v53, %v1011_v50  ;;  %v1048_v6 = vrot.slane %v2986_v1, 1  ;;  %v1066_v23 = vrot.slane %v2973_v59, 1  ;;  %v1146_v40 = vmul.f32 %v2841_v5, %v1030_v13 }
 0x11a   : > { %4385 = vst [vmem:[#allocation23_spill] sm:$0xff] %v3196_v35  ;;  %v1519_v15 = vadd.f32 %v1487_v36, %v1449_v25  ;;  %v1242_v56 = vadd.f32 %v2966_v57, %v3107_v2  ;;  %v1350_v54 = vmul.f32 %v2876_v52, %v3087_v43  ;;  %2440 = vmatprep.mubr.f32.mxu0 %v1765_v44 }
 0x11b   : > { %v1625_v50 = vmul.f32 %v2923_v38, %v2947_v48  ;;  %v1085_v45 = vsel %vm1080_vm4, %v1048_v6, %v1066_v23  ;;  %v1352_v28 = vmul.f32 %v2876_v52, %v1030_v13  ;;  %v1354_v25 = vmul.f32 %v2876_v52, %v3212_v9 }
 0x11c   : > { %v3228_v49 = vpop.f32.mrb[24].mxu0  ;;  %v1589_v36 = vadd.f32 %v1557_v34, %v1519_v15  ;;  %v1246_v57 = vadd.f32 %v3029_v41, %v1146_v40  ;;  %v1284_v2 = vmul.f32 %v2823_v12, %v1085_v45  ;;  %v1312_v43 = vadd.f32 %v3110_v14, %v1242_v56 }
 0x11d   : > { %4391 = vst [vmem:[#allocation25_spill] sm:$0xff] %v3228_v49  ;;  %v3235_v46 = vpop.f32.mrb[25].mxu0  ;;  %v3248_v44 = vmul.f32 %v2887_v60, %v1102_v18  ;;  %v1695_v48 = vmul.f32 %v2944_v47, %v1102_v18  ;;  %v1384_v49 = vadd.f32 %v1352_v28, %v1314_v7  ;;  %v1418_v41 = vmul.f32 %v2852_v30, %v2958_v11 }
 0x11e   : > { %4392 = vst [vmem:[#allocation26_spill] sm:$0xff] %v3235_v46  ;;  %v3253_v46 = vadd.f32 %v2830_v17, %v3079_v33  ;;  %v1657_v16 = vadd.f32 %v1625_v50, %v1589_v36  ;;  %v1316_v34 = vadd.f32 %v1284_v2, %v1246_v57  ;;  %v1382_v15 = vadd.f32 %v1350_v54, %v1312_v43 }
 0x11f   : > { %v1452_v14 = vadd.f32 %v3033_v22, %v1384_v49  ;;  %v1488_v18 = vmul.f32 %v2869_v42, %v3095_v63  ;;  %v1490_v56 = vmul.f32 %v2869_v42, %v1085_v45  ;;  %v4393_v33 = vrot.slane %v2973_v59, 7 }
 0x120   : > { %v3255_v35 = vpop.f32.mrb[26].mxu0  ;;  %v4394_v7 = vrot.slane %v2986_v1, 7  ;;  %v1727_v54 = vadd.f32 %v1695_v48, %v1657_v16  ;;  %v3271_v28 = vadd.f32 %v1354_v25, %v1316_v34  ;;  %v1450_v11 = vadd.f32 %v1418_v41, %v1382_v15 }
 0x121   : > { %v3259_v40 = vpop.f32.mrb[27].mxu0  ;;  %v1103_v36 = vsel %vm1080_vm4, %v1066_v23, %v1048_v6  ;;  %v1522_v49 = vadd.f32 %v1490_v56, %v1452_v14  ;;  %v3279_v57 = vadd.f32 %v3116_v20, %v2830_v17  ;;  %v1558_v25 = vmul.f32 %v2940_v8, %v1030_v13 }
 0x122   : > { %v1012_v50 = vsel %vm1007_vm3, %v4394_v7, %v4393_v33  ;;  %v1766_v43 = vadd.f32 %v3122_v27, %v1727_v54  ;;  %v1520_v16 = vadd.f32 %v1488_v18, %v1450_v11  ;;  %v3290_v6 = vmul.f32 %v2837_v21, %v3253_v46 }
 0x123   : > { %v1147_v48 = vmul.f32 %v2817_v10, %v1012_v50  ;;  %v3294_v23 = vmul.f32 %v2852_v30, %v3253_v46  ;;  %v1626_v20 = vmul.f32 %v2923_v38, %v2986_v1  ;;  %v1243_v15 = vadd.f32 %v2951_v51, %v2977_v61 }
 0x124   : > { %v3281_v2 = vpop.f32.mrb[28].mxu0  ;;  %2441 = vmatmul.mubr.f32.gmra.mrb[38].mxu0 %v1766_v43  ;;  %v1590_v13 = vadd.f32 %v1558_v25, %v1520_v16  ;;  %v1696_v41 = vmul.f32 %v2918_v32, %v1085_v45  ;;  %v1285_v18 = vmul.f32 %v2845_v24, %v1103_v36  ;;  %v4395_v54 = vrot.slane %v3005_v19, 1 }
 0x125   : > { %v3286_v34 = vpop.f32.mrb[29].mxu0  ;;  %v1247_v14 = vadd.f32 %v3017_v31, %v1147_v48  ;;  %v1313_v7 = vadd.f32 %v2981_v62, %v1243_v15  ;;  %v4396_v1 = vrot.slane %v3009_v26, 1  ;;  %v3316_v31 = vmul.f32 %v2837_v21, %v3279_v57 }
 0x126   : > { %v1658_v45 = vadd.f32 %v1626_v20, %v1590_v13  ;;  %v1148_v43 = vmul.f32 %v2841_v5, %v3212_v9  ;;  %v3326_v16 = vmul.f32 %v2852_v30, %v3279_v57  ;;  %v1353_v25 = vmul.f32 %v2849_v29, %v1012_v50 }
 0x127   : > { %v1086_v51 = vsel %vm1080_vm4, %v4396_v1, %v4395_v54  ;;  %v3318_v11 = vadd.f32 %v1285_v18, %v1247_v14  ;;  %v1383_v48 = vadd.f32 %v3219_v4, %v1313_v7  ;;  %v1491_v20 = vmul.f32 %v2887_v60, %v1103_v36  ;;  %v4400_v14 = vld [vmem:[#allocation9_spill] sm:$0xff]  ;;  %v4401_v1 = vld [vmem:[#allocation3_spill] sm:$0xff] }
 0x128   : > { %v3312_v61 = vpop.f32.mrb[30].mxu0  ;;  %4399 = vst [vmem:[#allocation29_spill] sm:$0xff] %v3326_v16  ;;  %v1728_v15 = vadd.f32 %v1696_v41, %v1658_v45  ;;  %v3333_v13 = vadd.f32 %v2830_v17, %v3130_v3  ;;  %v1248_v18 = vadd.f32 %v4400_v14, %v1148_v43  ;;  %v1286_v54 = vmul.f32 %v2823_v12, %v1086_v51  ;;  %v4414_v16 = vld [vmem:[#allocation5_spill] sm:$0xff] }
 0x129   : > { %4397 = vst [vmem:[#allocation27_spill] sm:$0xff] %v3312_v61  ;;  %v3322_v62 = vpop.f32.mrb[31].mxu0  ;;  %v1451_v33 = vadd.f32 %v4401_v1, %v1383_v48  ;;  %v1559_v56 = vmul.f32 %v2879_v53, %v1012_v50  ;;  %v1627_v63 = vmul.f32 %v2923_v38, %v2973_v59  ;;  %v1560_v4 = vmul.f32 %v2940_v8, %v3212_v9 }
 0x12a   : > { %4398 = vst [vmem:[#allocation28_spill] sm:$0xff] %v3322_v62  ;;  %v1767_v41 = vadd.f32 %v3122_v27, %v1728_v15  ;;  %v3346_v3 = vadd.f32 %v1286_v54, %v1248_v18  ;;  %v1628_v45 = vmul.f32 %v2923_v38, %v3009_v26  ;;  %v4403_v43 = vrot.slane %v3005_v19, 7 }
 0x12b   : > { %v4404_v48 = vrot.slane %v3009_v26, 7  ;;  %v1521_v9 = vadd.f32 %v3248_v44, %v1451_v33  ;;  %v1592_v14 = vadd.f32 %v1560_v4, %v1522_v49  ;;  %v4406_v1 = vrot.slane %v3009_v26, 1  ;;  %v4408_v33 = vld [vmem:[#allocation7_spill] sm:$0xff] }
 0x12c   : > { %v3343_v7 = vpop.f32.mrb[32].mxu0  ;;  %v4407_v15 = vrot.slane %v3005_v19, 1  ;;  %2443 = vmatprep.mubr.f32.mxu1 %v1767_v41  ;;  %v1697_v22 = vmul.f32 %v2944_v47, %v1103_v36  ;;  %v3371_v44 = vadd.f32 %v3151_v39, %v2830_v17  ;;  %v3380_v36 = vmul.f32 %v2837_v21, %v3333_v13 }
 0x12d   : > { %4402 = vst [vmem:[#allocation9_spill] sm:$0xff] %v3343_v7  ;;  %v1013_v50 = vsel %vm1007_vm3, %v4404_v48, %v4403_v43  ;;  %v3356_v59 = vpop.f32.mrb[33].mxu0  ;;  %v1698_v43 = vmul.f32 %v2918_v32, %v1086_v51  ;;  %v1591_v49 = vadd.f32 %v1559_v56, %v1521_v9  ;;  %v1660_v26 = vadd.f32 %v1628_v45, %v1592_v14  ;;  %v4411_v7 = vld [vmem:[#allocation4_spill] sm:$0xff] }
 0x12e   : > { %4405 = vst [vmem:[#allocation3_spill] sm:$0xff] %v3356_v59  ;;  %v1104_v18 = vsel %vm1080_vm4, %v4407_v15, %v4406_v1  ;;  %v1149_v54 = vmul.f32 %v2817_v10, %v1013_v50  ;;  %v3384_v15 = vmul.f32 %v2852_v30, %v3333_v13  ;;  %v1385_v39 = vadd.f32 %v1353_v25, %v3198_v55  ;;  %v4412_v59 = vld [vmem:[#allocation6_spill] sm:$0xff] }
 0x12f   : > { %v1287_v48 = vmul.f32 %v2845_v24, %v1104_v18  ;;  %v1659_v45 = vadd.f32 %v1627_v63, %v1591_v49  ;;  %v1492_v9 = vmul.f32 %v2869_v42, %v1086_v51  ;;  %v1730_v14 = vadd.f32 %v1698_v43, %v1660_v26 }
 0x130   : > { %v1249_v4 = vadd.f32 %v4408_v33, %v1149_v54  ;;  %v3375_v1 = vpop.f32.mrb[34].mxu0  ;;  %v4413_v62 = vrot.slane %v4412_v59, 7  ;;  %v4415_v61 = vrot.slane %v4414_v16, 7  ;;  %v3403_v63 = vadd.f32 %v2830_v17, %v3161_v37 }
 0x131   : > { %4409 = vst [vmem:[#allocation7_spill] sm:$0xff] %v3375_v1  ;;  %v3387_v56 = vpop.f32.mrb[35].mxu0  ;;  %v1453_v1 = vadd.f32 %v4411_v7, %v1385_v39  ;;  %v1729_v25 = vadd.f32 %v1697_v22, %v1659_v45  ;;  %v4416_v51 = vrot.slane %v4414_v16, 1  ;;  %v4417_v43 = vrot.slane %v4412_v59, 1 }
 0x132   : > { %4410 = vst [vmem:[#allocation30_spill] sm:$0xff] %v3387_v56  ;;  %v3390_v54 = vadd.f32 %v1287_v48, %v1249_v4  ;;  %v1032_v55 = vsel %vm1007_vm3, %v4415_v61, %v4413_v62  ;;  %v1769_v26 = vadd.f32 %v3122_v27, %v1730_v14  ;;  %v3415_v4 = vmul.f32 %v2837_v21, %v3371_v44  ;;  %v4418_v48 = vld [vmem:[#allocation14_spill] sm:$0xff] }
 0x133   : > { %v1087_v49 = vsel %vm1080_vm4, %v4417_v43, %v4416_v51  ;;  %v1150_v7 = vmul.f32 %v2841_v5, %v1032_v55  ;;  %v1523_v22 = vadd.f32 %v1491_v20, %v1453_v1  ;;  %v1561_v61 = vmul.f32 %v2879_v53, %v1013_v50  ;;  %v4420_v20 = vld [vmem:[#allocation10_spill] sm:$0xff] }
 0x134   : > { %v1768_v37 = vadd.f32 %v3122_v27, %v1729_v25  ;;  %v1355_v62 = vmul.f32 %v2849_v29, %v1013_v50  ;;  %v1288_v45 = vmul.f32 %v2823_v12, %v1087_v49  ;;  %v3424_v51 = vmul.f32 %v2852_v30, %v3371_v44 }
 0x135   : > { %v1250_v39 = vadd.f32 %v4418_v48, %v1150_v7  ;;  %v1593_v14 = vadd.f32 %v1561_v61, %v1523_v22  ;;  %v1629_v43 = vmul.f32 %v2923_v38, %v3005_v19  ;;  %v1454_v1 = vadd.f32 %v4420_v20, %v3271_v28  ;;  %v4431_v7 = vld [vmem:[#allocation13_spill] sm:$0xff] }
 0x136   : > { %4419 = vst [vmem:[#allocation4_spill] sm:$0xff] %v3424_v51  ;;  %2444 = vmatmul.mubr.f32.vlgmr.msra.gmra.mrb[0].mxu1 %v1768_v37  ;;  %v1493_v25 = vmul.f32 %v2887_v60, %v1104_v18  ;;  %v1699_v50 = vmul.f32 %v2944_v47, %v1104_v18  ;;  %v1562_v22 = vmul.f32 %v2940_v8, %v1032_v55  ;;  %v4421_v61 = vrot.slane %v4414_v16, 7 }
 0x137   : > { %v3433_v48 = vadd.f32 %v1288_v45, %v1250_v39  ;;  %2446 = vmatprep.mubr.f32.mxu1 %v1769_v26  ;;  %v1661_v41 = vadd.f32 %v1629_v43, %v1593_v14  ;;  %v1524_v33 = vadd.f32 %v1492_v9, %v1454_v1  ;;  %v4422_v19 = vrot.slane %v4412_v59, 7 }
 0x138   : > { %v4423_v18 = vrot.slane %v4412_v59, 1  ;;  %v4424_v20 = vrot.slane %v4414_v16, 1  ;;  %v1387_v39 = vadd.f32 %v1355_v62, %v3318_v11  ;;  %v3453_v14 = vmul.f32 %v2837_v21, %v3403_v63 }
 0x139   : > { %v1014_v28 = vsel %vm1007_vm3, %v4422_v19, %v4421_v61  ;;  %v1731_v45 = vadd.f32 %v1699_v50, %v1661_v41  ;;  %v1594_v43 = vadd.f32 %v1562_v22, %v1524_v33  ;;  %v1630_v1 = vmul.f32 %v2923_v38, %v4412_v59  ;;  %v4427_v50 = vld [vmem:[#allocation8_spill] sm:$0xff] }
 0x13a   : > { %v1105_v26 = vsel %vm1080_vm4, %v4424_v20, %v4423_v18  ;;  %v1151_v9 = vmul.f32 %v2817_v10, %v1014_v28  ;;  %v1356_v61 = vmul.f32 %v2876_v52, %v1032_v55  ;;  %v3460_v19 = vadd.f32 %v3187_v58, %v2830_v17  ;;  %v4426_v18 = vld [vmem:[#allocation11_spill] sm:$0xff] }
 0x13b   : > { %v1289_v37 = vmul.f32 %v2845_v24, %v1105_v26  ;;  %v1770_v11 = vadd.f32 %v3122_v27, %v1731_v45  ;;  %v1662_v41 = vadd.f32 %v1630_v1, %v1594_v43  ;;  %v1700_v62 = vmul.f32 %v2918_v32, %v1087_v49  ;;  %v4429_v43 = vld [vmem:[#allocation16_spill] sm:$0xff] }
 0x13c   : > { %4425 = vst [vmem:[#allocation6_spill] sm:$0xff] %v3460_v19  ;;  %v1251_v20 = vadd.f32 %v4426_v18, %v1151_v9  ;;  %v1455_v33 = vadd.f32 %v4427_v50, %v1387_v39  ;;  %v3469_v59 = vmul.f32 %v2852_v30, %v3403_v63  ;;  %v1494_v55 = vmul.f32 %v2869_v42, %v1087_v49 }
 0x13d   : > { %v1357_v58 = vmul.f32 %v2849_v29, %v1014_v28  ;;  %2447 = vmatmul.mubr.f32.gmra.mrb[2].mxu1 %v1770_v11  ;;  %v1732_v9 = vadd.f32 %v1700_v62, %v1662_v41  ;;  %v1563_v45 = vmul.f32 %v2879_v53, %v1014_v28  ;;  %v4430_v1 = vrot.slane %v4429_v43, 7 }
 0x13e   : > { %4428 = vst [vmem:[#allocation5_spill] sm:$0xff] %v3469_v59  ;;  %v3472_v22 = vadd.f32 %v1289_v37, %v1251_v20  ;;  %v1525_v18 = vadd.f32 %v1493_v25, %v1455_v33  ;;  %v4432_v56 = vrot.slane %v4431_v7, 7  ;;  %v4433_v49 = vrot.slane %v4431_v7, 1 }
 0x13f   : > { %v4434_v37 = vrot.slane %v4429_v43, 1  ;;  %v1388_v28 = vadd.f32 %v1356_v61, %v3346_v3  ;;  %v1771_v11 = vadd.f32 %v3122_v27, %v1732_v9  ;;  %v3497_v33 = vmul.f32 %v2837_v21, %v3460_v19 }
 0x140   : > { %v1033_v39 = vsel %vm1007_vm3, %v4432_v56, %v4430_v1  ;;  %v1595_v62 = vadd.f32 %v1563_v45, %v1525_v18  ;;  %v1631_v56 = vmul.f32 %v2923_v38, %v4414_v16  ;;  %v4436_v1 = vld [vmem:[#allocation23_spill] sm:$0xff]  ;;  %v3507_v61 = vmul.f32 %v2852_v30, %v3460_v19 }
 0x141   : > { %v1088_v20 = vsel %vm1080_vm4, %v4434_v37, %v4433_v49  ;;  %v1152_v25 = vmul.f32 %v2841_v5, %v1033_v39  ;;  %4435 = vst [vmem:[#allocation14_spill] sm:$0xff] %v3497_v33  ;;  %v3501_v50 = vadd.f32 %v2830_v17, %v4436_v1  ;;  %v4438_v49 = vld [vmem:[#allocation20_spill] sm:$0xff]  ;;  %2449 = vmatprep.mubr.f32.mxu1 %v1771_v11  ;;  %v4440_v18 = vld [vmem:[#allocation15_spill] sm:$0xff]  ;;  %v4442_v59 = vrot.slane %v4431_v7, 7 }
 0x142   : > { %v1290_v3 = vmul.f32 %v2823_v12, %v1088_v20  ;;  %4439 = vst [vmem:[#allocation11_spill] sm:$0xff] %v3507_v61  ;;  %v1663_v9 = vadd.f32 %v1631_v56, %v1595_v62  ;;  %v1701_v16 = vmul.f32 %v2944_v47, %v1105_v26  ;;  %v1456_v45 = vadd.f32 %v4440_v18, %v1388_v28  ;;  %v4449_v61 = vld [vmem:[#allocation12_spill] sm:$0xff]  ;;  %v4451_v19 = vld [vmem:[#allocation19_spill] sm:$0xff] }
 0x143   : > { %4437 = vst [vmem:[#allocation10_spill] sm:$0xff] %v3501_v50  ;;  %v1252_v37 = vadd.f32 %v4438_v49, %v1152_v25  ;;  %v1495_v41 = vmul.f32 %v2887_v60, %v1105_v26  ;;  %v1564_v1 = vmul.f32 %v2940_v8, %v1033_v39  ;;  %v4441_v25 = vld [vmem:[#allocation25_spill] sm:$0xff]  ;;  %v4443_v62 = vrot.slane %v4429_v43, 7 }
 0x144   : > { %v3517_v49 = vadd.f32 %v4441_v25, %v2830_v17  ;;  %v1733_v11 = vadd.f32 %v1701_v16, %v1663_v9  ;;  %v1526_v33 = vadd.f32 %v1494_v55, %v1456_v45  ;;  %v4444_v28 = vrot.slane %v4429_v43, 1 }
 0x145   : > { %v3512_v51 = vadd.f32 %v1290_v3, %v1252_v37  ;;  %v1015_v56 = vsel %vm1007_vm3, %v4443_v62, %v4442_v59  ;;  %v4445_v26 = vrot.slane %v4431_v7, 1  ;;  %v3535_v55 = vmul.f32 %v2837_v21, %v3501_v50 }
 0x146   : > { %v1358_v9 = vmul.f32 %v2876_v52, %v1033_v39  ;;  %v1772_v16 = vadd.f32 %v3122_v27, %v1733_v11  ;;  %v1596_v59 = vadd.f32 %v1564_v1, %v1526_v33  ;;  %v1632_v45 = vmul.f32 %v2923_v38, %v4429_v43  ;;  %v4448_v33 = vld [vmem:[#allocation17_spill] sm:$0xff] }
 0x147   : > { %v1106_v37 = vsel %vm1080_vm4, %v4445_v26, %v4444_v28  ;;  %4446 = vst [vmem:[#allocation8_spill] sm:$0xff] %v3535_v55  ;;  %v1153_v25 = vmul.f32 %v2817_v10, %v1015_v56  ;;  %v3544_v62 = vmul.f32 %v2852_v30, %v3501_v50  ;;  %v1496_v28 = vmul.f32 %v2869_v42, %v1088_v20 }
 0x148   : > { %v1702_v26 = vmul.f32 %v2918_v32, %v1088_v20  ;;  %v1389_v18 = vadd.f32 %v1357_v58, %v3390_v54  ;;  %2450 = vmatmul.mubr.f32.gmra.mrb[4].mxu1 %v1772_v16  ;;  %v1664_v39 = vadd.f32 %v1632_v45, %v1596_v59  ;;  %v1291_v43 = vmul.f32 %v2845_v24, %v1106_v37 }
 0x149   : > { %4447 = vst [vmem:[#allocation16_spill] sm:$0xff] %v3544_v62  ;;  %v1253_v1 = vadd.f32 %v4448_v33, %v1153_v25  ;;  %v4450_v62 = vrot.slane %v3253_v46, 7  ;;  %v4452_v50 = vrot.slane %v4451_v19, 7  ;;  %v4453_v54 = vrot.slane %v4451_v19, 1  ;;  %v4455_v25 = vld [vmem:[#allocation26_spill] sm:$0xff] }
 0x14a   : > { %v1457_v55 = vadd.f32 %v4449_v61, %v1389_v18  ;;  %v4454_v58 = vrot.slane %v3253_v46, 1  ;;  %v1734_v59 = vadd.f32 %v1702_v26, %v1664_v39  ;;  %v3570_v61 = vadd.f32 %v2830_v17, %v4455_v25 }
 0x14b   : > { %v1034_v20 = vsel %vm1007_vm3, %v4452_v50, %v4450_v62  ;;  %v3566_v45 = vadd.f32 %v1291_v43, %v1253_v1  ;;  %v3575_v33 = vmul.f32 %v2837_v21, %v3517_v49  ;;  %v3579_v50 = vmul.f32 %v2852_v30, %v3517_v49 }
 0x14c   : > { %v1089_v16 = vsel %vm1080_vm4, %v4454_v58, %v4453_v54  ;;  %v1154_v18 = vmul.f32 %v2841_v5, %v1034_v20  ;;  %v1527_v62 = vadd.f32 %v1495_v41, %v1457_v55  ;;  %v1565_v54 = vmul.f32 %v2879_v53, %v1015_v56 }
 0x14d   : > { %4456 = vst [vmem:[#allocation13_spill] sm:$0xff] %v3575_v33  ;;  %4457 = vst [vmem:[#allocation23_spill] sm:$0xff] %v3579_v50  ;;  %v1773_v26 = vadd.f32 %v3122_v27, %v1734_v59  ;;  %v1359_v39 = vmul.f32 %v2849_v29, %v1015_v56  ;;  %v1292_v43 = vmul.f32 %v2823_v12, %v1089_v16  ;;  %v4459_v33 = vrot.slane %v4451_v19, 7 }
 0x14e   : > { %v1254_v1 = vadd.f32 %v3290_v6, %v1154_v18  ;;  %v1497_v58 = vmul.f32 %v2887_v60, %v1106_v37  ;;  %v1597_v25 = vadd.f32 %v1565_v54, %v1527_v62  ;;  %v1633_v3 = vmul.f32 %v2923_v38, %v4431_v7  ;;  %v4458_v18 = vld [vmem:[#allocation21_spill] sm:$0xff] }
 0x14f   : > { %v1390_v11 = vadd.f32 %v1358_v9, %v3433_v48  ;;  %2452 = vmatprep.mubr.f32.mxu1 %v1773_v26  ;;  %v1703_v41 = vmul.f32 %v2944_v47, %v1106_v37  ;;  %v4460_v62 = vrot.slane %v3253_v46, 7  ;;  %v4461_v48 = vrot.slane %v3253_v46, 1 }
 0x150   : > { %v3593_v56 = vadd.f32 %v1292_v43, %v1254_v1  ;;  %v1665_v6 = vadd.f32 %v1633_v3, %v1597_v25  ;;  %v4462_v37 = vrot.slane %v4451_v19, 1  ;;  %v3610_v54 = vmul.f32 %v2837_v21, %v3570_v61 }
 0x151   : > { %v1458_v50 = vadd.f32 %v4458_v18, %v1390_v11  ;;  %v1016_v7 = vsel %vm1007_vm3, %v4460_v62, %v4459_v33  ;;  %v3614_v3 = vmul.f32 %v2852_v30, %v3570_v61  ;;  %v1360_v11 = vmul.f32 %v2876_v52, %v1034_v20 }
 0x152   : > { %v1107_v9 = vsel %vm1080_vm4, %v4462_v37, %v4461_v48  ;;  %4463 = vst [vmem:[#allocation20_spill] sm:$0xff] %v3610_v54  ;;  %v3619_v33 = vadd.f32 %v3255_v35, %v2830_v17  ;;  %v1735_v26 = vadd.f32 %v1703_v41, %v1665_v6  ;;  %v1566_v43 = vmul.f32 %v2940_v8, %v1034_v20  ;;  %v4465_v35 = vld [vmem:[#allocation22_spill] sm:$0xff]  ;;  %v4495_v20 = vld [vmem:[#allocation5_spill] sm:$0xff] }
 0x153   : > { %4464 = vst [vmem:[#allocation15_spill] sm:$0xff] %v3614_v3  ;;  %v1528_v1 = vadd.f32 %v1496_v28, %v1458_v50  ;;  %v1155_v25 = vmul.f32 %v2817_v10, %v1016_v7  ;;  %v1498_v18 = vmul.f32 %v2869_v42, %v1089_v16  ;;  %v1634_v62 = vmul.f32 %v2923_v38, %v3253_v46  ;;  %v4466_v41 = vld [vmem:[#allocation18_spill] sm:$0xff] }
 0x154   : > { %v1704_v48 = vmul.f32 %v2918_v32, %v1089_v16  ;;  %v1391_v37 = vadd.f32 %v1359_v39, %v3472_v22  ;;  %v1774_v59 = vadd.f32 %v3122_v27, %v1735_v26  ;;  %v1293_v28 = vmul.f32 %v2845_v24, %v1107_v9 }
 0x155   : > { %v1598_v55 = vadd.f32 %v1566_v43, %v1528_v1  ;;  %v1255_v3 = vadd.f32 %v4465_v35, %v1155_v25  ;;  %v4467_v54 = vrot.slane %v3333_v13, 7  ;;  %v4468_v46 = vrot.slane %v3279_v57, 7 }
 0x156   : > { %v1459_v6 = vadd.f32 %v4466_v41, %v1391_v37  ;;  %2453 = vmatmul.mubr.f32.gmra.mrb[6].mxu1 %v1774_v59  ;;  %v4469_v26 = vrot.slane %v3279_v57, 1  ;;  %v4470_v1 = vrot.slane %v3333_v13, 1  ;;  %v3651_v37 = vmul.f32 %v2837_v21, %v3619_v33 }
 0x157   : > { %v1035_v22 = vsel %vm1007_vm3, %v4468_v46, %v4467_v54  ;;  %v1666_v16 = vadd.f32 %v1634_v62, %v1598_v55  ;;  %v3640_v39 = vadd.f32 %v1293_v28, %v1255_v3  ;;  %v1567_v54 = vmul.f32 %v2879_v53, %v1016_v7 }
 0x158   : > { %v1090_v43 = vsel %vm1080_vm4, %v4470_v1, %v4469_v26  ;;  %v1156_v25 = vmul.f32 %v2841_v5, %v1035_v22  ;;  %v1529_v35 = vadd.f32 %v1497_v58, %v1459_v6  ;;  %v3656_v55 = vadd.f32 %v2830_v17, %v3259_v40 }
 0x159   : > { %v1736_v59 = vadd.f32 %v1704_v48, %v1666_v16  ;;  %v1361_v3 = vmul.f32 %v2849_v29, %v1016_v7  ;;  %v1294_v28 = vmul.f32 %v2823_v12, %v1090_v43  ;;  %v3663_v41 = vmul.f32 %v2852_v30, %v3619_v33 }
 0x15a   : > { %v1256_v62 = vadd.f32 %v3380_v36, %v1156_v25  ;;  %v1599_v46 = vadd.f32 %v1567_v54, %v1529_v35  ;;  %v1635_v58 = vmul.f32 %v2923_v38, %v4451_v19  ;;  %v1392_v6 = vadd.f32 %v1360_v11, %v3512_v51 }
 0x15b   : > { %v1775_v40 = vadd.f32 %v3122_v27, %v1736_v59  ;;  %v1499_v48 = vmul.f32 %v2887_v60, %v1107_v9  ;;  %v1705_v7 = vmul.f32 %v2944_v47, %v1107_v9  ;;  %v3678_v19 = vmul.f32 %v2837_v21, %v3656_v55 }
 0x15c   : > { %v3671_v16 = vadd.f32 %v1294_v28, %v1256_v62  ;;  %v1667_v36 = vadd.f32 %v1635_v58, %v1599_v46  ;;  %v1460_v25 = vadd.f32 %v3294_v23, %v1392_v6  ;;  %v4471_v51 = vrot.slane %v3279_v57, 7 }
 0x15d   : > { %2455 = vmatprep.mubr.f32.mxu1 %v1775_v40  ;;  %v4472_v11 = vrot.slane %v3333_v13, 7  ;;  %v4473_v35 = vmov %v4470_v1  ;;  %v4474_v54 = vmov %v4469_v26  ;;  %v1393_v23 = vadd.f32 %v1361_v3, %v3566_v45 }
 0x15e   : > { %v1108_v59 = vsel %vm1080_vm4, %v4474_v54, %v4473_v35  ;;  %v1737_v62 = vadd.f32 %v1705_v7, %v1667_v36  ;;  %v3695_v28 = vmul.f32 %v2852_v30, %v3656_v55  ;;  %v1530_v46 = vadd.f32 %v1498_v18, %v1460_v25  ;;  %v4475_v36 = vld [vmem:[#allocation24_spill] sm:$0xff] }
 0x15f   : > { %v1017_v9 = vsel %vm1007_vm3, %v4472_v11, %v4471_v51  ;;  %v1568_v58 = vmul.f32 %v2940_v8, %v1035_v22  ;;  %v1362_v6 = vmul.f32 %v2876_v52, %v1035_v22  ;;  %v1500_v40 = vmul.f32 %v2869_v42, %v1090_v43 }
 0x160   : > { %v3702_v51 = vadd.f32 %v3281_v2, %v2830_v17  ;;  %v1157_v11 = vmul.f32 %v2817_v10, %v1017_v9  ;;  %v1776_v45 = vadd.f32 %v3122_v27, %v1737_v62  ;;  %v1636_v7 = vmul.f32 %v2923_v38, %v3333_v13 }
 0x161   : > { %v1600_v3 = vadd.f32 %v1568_v58, %v1530_v46  ;;  %v1461_v18 = vadd.f32 %v4475_v36, %v1393_v23  ;;  %v1706_v25 = vmul.f32 %v2918_v32, %v1090_v43  ;;  %v1295_v35 = vmul.f32 %v2845_v24, %v1108_v59  ;;  %v4490_v43 = vld [vmem:[#allocation6_spill] sm:$0xff] }
 0x162   : > { %v1257_v22 = vadd.f32 %v3316_v31, %v1157_v11  ;;  %v1637_v2 = vmul.f32 %v2923_v38, %v3279_v57  ;;  %2456 = vmatmul.mubr.f32.gmra.mrb[8].mxu1 %v1776_v45  ;;  %v1569_v62 = vmul.f32 %v2879_v53, %v1017_v9  ;;  %v4476_v46 = vrot.slane %v3403_v63, 7 }
 0x163   : > { %v1668_v54 = vadd.f32 %v1636_v7, %v1600_v3  ;;  %v1531_v1 = vadd.f32 %v1499_v48, %v1461_v18  ;;  %v4477_v13 = vrot.slane %v3371_v44, 7  ;;  %v4478_v58 = vrot.slane %v3371_v44, 1 }
 0x164   : > { %v3722_v31 = vadd.f32 %v1295_v35, %v1257_v22  ;;  %v4479_v57 = vrot.slane %v3403_v63, 1  ;;  %v3736_v7 = vmul.f32 %v2837_v21, %v3702_v51  ;;  %v1363_v18 = vmul.f32 %v2849_v29, %v1017_v9 }
 0x165   : > { %v1036_v23 = vsel %vm1007_vm3, %v4477_v13, %v4476_v46  ;;  %v1738_v45 = vadd.f32 %v1706_v25, %v1668_v54  ;;  %v1601_v36 = vadd.f32 %v1569_v62, %v1531_v1  ;;  %v3741_v22 = vadd.f32 %v2830_v17, %v3286_v34 }
 0x166   : > { %v3730_v48 = vsel %vm1080_vm4, %v4479_v57, %v4478_v58  ;;  %v1158_v11 = vmul.f32 %v2841_v5, %v1036_v23  ;;  %v1707_v13 = vmul.f32 %v2944_v47, %v1108_v59  ;;  %v1394_v58 = vadd.f32 %v1362_v6, %v3593_v56 }
 0x167   : > { %v1296_v46 = vmul.f32 %v2823_v12, %v3730_v48  ;;  %v1777_v25 = vadd.f32 %v3122_v27, %v1738_v45  ;;  %v1669_v54 = vadd.f32 %v1637_v2, %v1601_v36  ;;  %v3751_v1 = vmul.f32 %v2852_v30, %v3702_v51  ;;  %v4481_v2 = vld [vmem:[#allocation27_spill] sm:$0xff] }
 0x168   : > { %v1258_v35 = vadd.f32 %v3453_v14, %v1158_v11  ;;  %v1501_v9 = vmul.f32 %v2887_v60, %v1108_v59  ;;  %v1364_v14 = vmul.f32 %v2876_v52, %v1036_v23  ;;  %v1462_v57 = vadd.f32 %v3384_v15, %v1394_v58 }
 0x169   : > { %4480 = vst [vmem:[#allocation25_spill] sm:$0xff] %v3751_v1  ;;  %2458 = vmatprep.mubr.f32.mxu1 %v1777_v25  ;;  %v1739_v62 = vadd.f32 %v1707_v13, %v1669_v54  ;;  %v3760_v11 = vadd.f32 %v4481_v2, %v2830_v17  ;;  %v4482_v56 = vrot.slane %v3371_v44, 7  ;;  %v4483_v6 = vrot.slane %v3403_v63, 7 }
 0x16a   : > { %v3754_v34 = vadd.f32 %v1296_v46, %v1258_v35  ;;  %v4484_v36 = vrot.slane %v3403_v63, 1  ;;  %v4485_v35 = vrot.slane %v3371_v44, 1  ;;  %v1395_v25 = vadd.f32 %v1363_v18, %v3640_v39 }
 0x16b   : > { %v1018_v45 = vsel %vm1007_vm3, %v4483_v6, %v4482_v56  ;;  %v1778_v54 = vadd.f32 %v3122_v27, %v1739_v62  ;;  %v1532_v58 = vadd.f32 %v1500_v40, %v1462_v57  ;;  %v1570_v2 = vmul.f32 %v2940_v8, %v1036_v23  ;;  %v4486_v62 = vld [vmem:[#allocation29_spill] sm:$0xff] }
 0x16c   : > { %v1109_v15 = vsel %vm1080_vm4, %v4485_v35, %v4484_v36  ;;  %v1159_v46 = vmul.f32 %v2817_v10, %v1018_v45  ;;  %v3782_v56 = vmul.f32 %v2837_v21, %v3741_v22  ;;  %v1638_v6 = vmul.f32 %v2923_v38, %v3403_v63  ;;  %v4487_v63 = vld [vmem:[#allocation28_spill] sm:$0xff] }
 0x16d   : > { %v1297_v35 = vmul.f32 %v2845_v24, %v1109_v15  ;;  %2459 = vmatmul.mubr.f32.gmra.mrb[10].mxu1 %v1778_v54  ;;  %v1602_v39 = vadd.f32 %v1570_v2, %v1532_v58  ;;  %v1708_v18 = vmul.f32 %v2918_v32, %v3730_v48  ;;  %v4349_v40 = vrot.slane %v3760_v11, 7  ;;  %v4488_v58 = vld [vmem:[#allocation10_spill] sm:$0xff] }
 0x16e   : > { %v1259_v36 = vadd.f32 %v3415_v4, %v1159_v46  ;;  %v1463_v23 = vadd.f32 %v4486_v62, %v1395_v25  ;;  %v4350_v57 = vrot.slane %v3760_v11, 1  ;;  %v1571_v3 = vmul.f32 %v2879_v53, %v1018_v45 }
 0x16f   : > { %v3798_v4 = vadd.f32 %v2830_v17, %v4487_v63  ;;  %v1670_v46 = vadd.f32 %v1638_v6, %v1602_v39  ;;  %v4489_v2 = vrot.slane %v4488_v58, 7  ;;  %v4491_v32 = vrot.slane %v4490_v43, 7 }
 0x170   : > { %v3793_v13 = vadd.f32 %v1297_v35, %v1259_v36  ;;  %v1533_v54 = vadd.f32 %v1501_v9, %v1463_v23  ;;  %v4492_v25 = vrot.slane %v4490_v43, 1  ;;  %v4493_v36 = vrot.slane %v4488_v58, 1 }
 0x171   : > { %v1037_v59 = vsel %vm1007_vm3, %v4491_v32, %v4489_v2  ;;  %v1639_v62 = vmul.f32 %v2923_v38, %v3371_v44  ;;  %v1709_v6 = vmul.f32 %v2944_v47, %v1109_v15  ;;  %v4348_v9 = vrot.slane %v3798_v4, 7 }
 0x172   : > { %v1092_v35 = vsel %vm1080_vm4, %v4493_v36, %v4492_v25  ;;  %v4351_v39 = vrot.slane %v3798_v4, 1  ;;  %v1740_v23 = vadd.f32 %v1708_v18, %v1670_v46  ;;  %v1603_v63 = vadd.f32 %v1571_v3, %v1533_v54 }
 0x173   : > { %v1236_v2 = vmul.f32 %v2837_v21, %v3798_v4  ;;  %v1160_v32 = vmul.f32 %v2841_v5, %v1037_v59  ;;  %v3826_v44 = vsel %vm1007_vm3, %v4349_v40, %v4348_v9  ;;  %v1298_v18 = vmul.f32 %v2823_v12, %v1092_v35  ;;  %v4494_v9 = vld [vmem:[#allocation8_spill] sm:$0xff] }
 0x174   : > { %v3834_v3 = vsel %vm1080_vm4, %v4351_v39, %v4350_v57  ;;  %v1396_v46 = vadd.f32 %v1364_v14, %v3671_v16  ;;  %v1779_v54 = vadd.f32 %v3122_v27, %v1740_v23  ;;  %v1671_v25 = vadd.f32 %v1639_v62, %v1603_v63 }
 0x175   : > { %v1168_v36 = vmul.f32 %v2841_v5, %v3826_v44  ;;  %v1260_v40 = vadd.f32 %v4494_v9, %v1160_v32  ;;  %v3844_v50 = vmul.f32 %v2852_v30, %v3741_v22  ;;  %v1502_v57 = vmul.f32 %v2869_v42, %v3730_v48  ;;  %v4496_v9 = vld [vmem:[#allocation9_spill] sm:$0xff] }
 0x176   : > { %v1365_v39 = vmul.f32 %v2849_v29, %v1018_v45  ;;  %v1464_v26 = vadd.f32 %v4495_v20, %v1396_v46  ;;  %2461 = vmatprep.mubr.f32.mxu1 %v1779_v54  ;;  %v1741_v16 = vadd.f32 %v1709_v6, %v1671_v25  ;;  %v1572_v23 = vmul.f32 %v2940_v8, %v1037_v59 }
 0x177   : > { %v1268_v14 = vadd.f32 %v1236_v2, %v1168_v36  ;;  %v3850_v62 = vadd.f32 %v1298_v18, %v1260_v40  ;;  %v3855_v32 = vadd.f32 %v4496_v9, %v2830_v17  ;;  %v4497_v1 = vrot.slane %v4490_v43, 7  ;;  %v4503_v9 = vld [vmem:[#allocation14_spill] sm:$0xff] }
 0x178   : > { %v1534_v63 = vadd.f32 %v1502_v57, %v1464_v26  ;;  %v4498_v48 = vrot.slane %v4488_v58, 7  ;;  %v4499_v20 = vrot.slane %v4488_v58, 1  ;;  %v4500_v6 = vrot.slane %v4490_v43, 1 }
 0x179   : > { %v3871_v26 = vmul.f32 %v2837_v21, %v3760_v11  ;;  %v3875_v57 = vmul.f32 %v2852_v30, %v3760_v11  ;;  %v1780_v2 = vadd.f32 %v3122_v27, %v1741_v16  ;;  %v1366_v46 = vmul.f32 %v2876_v52, %v1037_v59  ;;  %v3886_v21 = vld [vmem:[%s4327_s5 + $0x8] ss:$0 sm:$0xff] }
 0x17a   : > { %v1019_v45 = vsel %vm1007_vm3, %v4498_v48, %v4497_v1  ;;  %v1110_v40 = vsel %vm1080_vm4, %v4500_v6, %v4499_v20  ;;  %v1503_v1 = vmul.f32 %v2887_v60, %v1109_v15  ;;  %v1604_v54 = vadd.f32 %v1572_v23, %v1534_v63  ;;  %v4504_v6 = vld [vmem:[#allocation4_spill] sm:$0xff] }
 0x17b   : > { %4501 = vst [vmem:[#allocation17_spill] sm:$0xff] %v3871_v26  ;;  %4502 = vst [vmem:[#allocation12_spill] sm:$0xff] %v3875_v57  ;;  %v1161_v18 = vmul.f32 %v2817_v10, %v1019_v45  ;;  %v1640_v25 = vmul.f32 %v2923_v38, %v4488_v58  ;;  %2462 = vmatmul.mubr.f32.gmra.mrb[12].mxu1 %v1780_v2  ;;  %v1710_v36 = vmul.f32 %v3886_v21, %v1092_v35  ;;  %v4505_v57 = vld [vmem:[#allocation3_spill] sm:$0xff] }
 0x17c   : > { %v1299_v48 = vmul.f32 %v2845_v24, %v1110_v40  ;;  %v1397_v15 = vadd.f32 %v1365_v39, %v3722_v31  ;;  %v1573_v58 = vmul.f32 %v2879_v53, %v1019_v45  ;;  %v3900_v26 = vadd.f32 %v2830_v17, %v4505_v57 }
 0x17d   : > { %v1261_v16 = vadd.f32 %v4503_v9, %v1161_v18  ;;  %v1672_v20 = vadd.f32 %v1640_v25, %v1604_v54  ;;  %v1306_v18 = vmul.f32 %v2823_v12, %v3834_v3  ;;  %v4506_v31 = vrot.slane %v3570_v61, 7 }
 0x17e   : > { %v1465_v2 = vadd.f32 %v4504_v6, %v1397_v15  ;;  %v4507_v39 = vrot.slane %v3517_v49, 7  ;;  %v4508_v25 = vrot.slane %v3517_v49, 1  ;;  %v1398_v17 = vadd.f32 %v1366_v46, %v3754_v34 }
 0x17f   : > { %v3895_v63 = vadd.f32 %v1299_v48, %v1261_v16  ;;  %v1742_v9 = vadd.f32 %v1710_v36, %v1672_v20  ;;  %v4509_v16 = vrot.slane %v3570_v61, 1  ;;  %v4353_v15 = vrot.slane %v3900_v26, 7 }
 0x180   : > { %v1038_v54 = vsel %vm1007_vm3, %v4507_v39, %v4506_v31  ;;  %v1535_v57 = vadd.f32 %v1503_v1, %v1465_v2  ;;  %v4352_v36 = vrot.slane %v3900_v26, 1  ;;  %v1338_v20 = vadd.f32 %v1306_v18, %v1268_v14  ;;  %v4515_v2 = vld [vmem:[#allocation16_spill] sm:$0xff] }
 0x181   : > { %v1093_v48 = vsel %vm1080_vm4, %v4509_v16, %v4508_v25  ;;  %v1504_v6 = vmul.f32 %v2869_v42, %v1092_v35  ;;  %v1781_v23 = vadd.f32 %v3122_v27, %v1742_v9  ;;  %v1367_v31 = vmul.f32 %v2849_v29, %v1019_v45  ;;  %v4514_v45 = vld [vmem:[#allocation20_spill] sm:$0xff] }
 0x182   : > { %v1162_v39 = vmul.f32 %v2841_v5, %v1038_v54  ;;  %v1605_v59 = vadd.f32 %v1573_v58, %v1535_v57  ;;  %v1641_v25 = vmul.f32 %v2923_v38, %v4490_v43  ;;  %v4510_v34 = vrot.slane %v3855_v32, 7 }
 0x183   : > { %v4512_v35 = vrot.slane %v3855_v32, 1  ;;  %2464 = vmatprep.mubr.f32.mxu1 %v1781_v23  ;;  %v1300_v58 = vmul.f32 %v2823_v12, %v1093_v48  ;;  %v1466_v18 = vadd.f32 %v4515_v2, %v1398_v17  ;;  %v3948_v9 = vmul.f32 %v2852_v30, %v3798_v4 }
 0x184   : > { %v3931_v1 = vsel %vm1007_vm3, %v4510_v34, %v4353_v15  ;;  %v1262_v46 = vadd.f32 %v4514_v45, %v1162_v39  ;;  %v1673_v16 = vadd.f32 %v1641_v25, %v1605_v59  ;;  %v1711_v57 = vmul.f32 %v2944_v47, %v1110_v40 }
 0x185   : > { %4511 = vst [vmem:[#allocation19_spill] sm:$0xff] %v3931_v1  ;;  %v3939_v14 = vsel %vm1080_vm4, %v4352_v36, %v4512_v35  ;;  %v1376_v43 = vmul.f32 %v2876_v52, %v3931_v1  ;;  %v1444_v34 = vmul.f32 %v2852_v30, %v3900_v26  ;;  %v1536_v36 = vadd.f32 %v1504_v6, %v1466_v18 }
 0x186   : > { %4513 = vst [vmem:[#allocation26_spill] sm:$0xff] %v3939_v14  ;;  %v3953_v35 = vadd.f32 %v1300_v58, %v1262_v46  ;;  %v1574_v39 = vmul.f32 %v2940_v8, %v1038_v54  ;;  %v1743_v45 = vadd.f32 %v1711_v57, %v1673_v16  ;;  %v4516_v15 = vrot.slane %v3517_v49, 7 }
 0x187   : > { %v1408_v23 = vadd.f32 %v1376_v43, %v1338_v20  ;;  %v4517_v17 = vrot.slane %v3570_v61, 7  ;;  %v4518_v59 = vrot.slane %v3570_v61, 1  ;;  %v4519_v25 = vrot.slane %v3517_v49, 1 }
 0x188   : > { %v1399_v43 = vadd.f32 %v1367_v31, %v3793_v13  ;;  %v1606_v46 = vadd.f32 %v1574_v39, %v1536_v36  ;;  %v1642_v58 = vmul.f32 %v2923_v38, %v3570_v61  ;;  %v3974_v16 = vmul.f32 %v2852_v30, %v3855_v32  ;;  %v4521_v31 = vld [vmem:[#allocation13_spill] sm:$0xff]  ;;  %v4522_v39 = vld [vmem:[#allocation2_spill] sm:$0xff]  ;;  %v4523_v30 = vld [vmem:[#allocation7_spill] sm:$0xff] }
 0x189   : > { %v1020_v2 = vsel %vm1007_vm3, %v4517_v17, %v4516_v15  ;;  %v1111_v20 = vsel %vm1080_vm4, %v4519_v25, %v4518_v59  ;;  %v1476_v6 = vadd.f32 %v1444_v34, %v1408_v23  ;;  %v1505_v15 = vmul.f32 %v2887_v60, %v1110_v40  ;;  %v4520_v17 = vld [vmem:[#allocation11_spill] sm:$0xff]  ;;  %v4524_v40 = vld [vmem:[#allocation30_spill] sm:$0xff] }
 0x18a   : > { %v1163_v18 = vmul.f32 %v2817_v10, %v1020_v2  ;;  %v1782_v57 = vadd.f32 %v3122_v27, %v1743_v45  ;;  %v1467_v1 = vadd.f32 %v4520_v17, %v1399_v43  ;;  %v1674_v59 = vadd.f32 %v1642_v58, %v1606_v46 }
 0x18b   : > { %v1712_v13 = vmul.f32 %v3886_v21, %v1093_v48  ;;  %v1301_v34 = vmul.f32 %v2845_v24, %v1111_v20  ;;  %v1575_v23 = vmul.f32 %v2879_v53, %v1020_v2  ;;  %v3985_v25 = vadd.f32 %v4523_v30, %v4522_v39 }
 0x18c   : > { %v1263_v36 = vadd.f32 %v4521_v31, %v1163_v18  ;;  %2465 = vmatmul.mubr.f32.gmra.mrb[14].mxu1 %v1782_v57  ;;  %v1537_v61 = vadd.f32 %v1505_v15, %v1467_v1  ;;  %v3989_v27 = vadd.f32 %v4522_v39, %v4524_v40  ;;  %v1514_v46 = vmul.f32 %v2869_v42, %v3939_v14  ;;  %v4009_v31 = vld [vmem:[%s4328_s6] ss:$0 sm:$0xff] }
 0x18d   : > { %v1744_v45 = vadd.f32 %v1712_v13, %v1674_v59  ;;  %v4525_v58 = vrot.slane %v3656_v55, 7  ;;  %v4526_v1 = vrot.slane %v3619_v33, 7  ;;  %v1368_v15 = vmul.f32 %v2876_v52, %v1038_v54 }
 0x18e   : > { %v3991_v43 = vadd.f32 %v1301_v34, %v1263_v36  ;;  %v1607_v57 = vadd.f32 %v1575_v23, %v1537_v61  ;;  %v1643_v17 = vmul.f32 %v2923_v38, %v3517_v49  ;;  %v1004_v59 = vrot.slane %v3985_v25, 7 }
 0x18f   : > { %v1039_v18 = vsel %vm1007_vm3, %v4526_v1, %v4525_v58  ;;  %v1506_v13 = vmul.f32 %v2869_v42, %v1093_v48  ;;  %v1783_v36 = vadd.f32 %v4009_v31, %v1744_v45  ;;  %v986_v34 = vrot.slane %v3989_v27, 7 }
 0x190   : > { %v1546_v39 = vadd.f32 %v1514_v46, %v1476_v6  ;;  %v1675_v30 = vadd.f32 %v1643_v17, %v1607_v57  ;;  %v1713_v54 = vmul.f32 %v2944_v47, %v1111_v20  ;;  %v4527_v61 = vrot.slane %v3619_v33, 1 }
 0x191   : > { %v4528_v49 = vrot.slane %v3656_v55, 1  ;;  %v1164_v23 = vmul.f32 %v2841_v5, %v1039_v18  ;;  %2467 = vmatprep.mubr.f32.mxu1 %v1783_v36  ;;  %v1369_v40 = vmul.f32 %v2849_v29, %v1020_v2  ;;  %v1507_v45 = vmul.f32 %v2887_v60, %v1111_v20 }
 0x192   : > { %v4025_v6 = vsel %vm1007_vm3, %v986_v34, %v1004_v59  ;;  %v1043_v46 = vsel %vm1007_vm3, %v1004_v59, %v986_v34  ;;  %v1745_v58 = vadd.f32 %v1713_v54, %v1675_v30  ;;  %v1652_v20 = vmul.f32 %v2923_v38, %v3989_v27  ;;  %v4529_v30 = vld [vmem:[#allocation15_spill] sm:$0xff] }
 0x193   : > { %v1094_v48 = vsel %vm1080_vm4, %v4528_v49, %v4527_v61  ;;  %v1584_v1 = vmul.f32 %v2940_v8, %v1043_v46  ;;  %v1264_v57 = vadd.f32 %v3678_v19, %v1164_v23  ;;  %v1400_v61 = vadd.f32 %v1368_v15, %v3850_v62 }
 0x194   : > { %v1302_v17 = vmul.f32 %v2823_v12, %v1094_v48  ;;  %v1784_v49 = vadd.f32 %v4009_v31, %v1745_v58  ;;  %v1370_v34 = vmul.f32 %v2876_v52, %v1039_v18  ;;  %v4530_v19 = vrot.slane %v3619_v33, 7 }
 0x195   : > { %v1616_v14 = vadd.f32 %v1584_v1, %v1546_v39  ;;  %v1468_v54 = vadd.f32 %v4529_v30, %v1400_v61  ;;  %v4531_v23 = vrot.slane %v3656_v55, 7  ;;  %v4532_v2 = vrot.slane %v3656_v55, 1 }
 0x196   : > { %v1334_v59 = vadd.f32 %v1302_v17, %v1264_v57  ;;  %v4533_v36 = vrot.slane %v3619_v33, 1  ;;  %v1401_v15 = vadd.f32 %v1369_v40, %v3895_v63  ;;  %2468 = vmatmul.mubr.f32.gmra.mrb[16].mxu1 %v1784_v49  ;;  %v1508_v58 = vmul.f32 %v2869_v42, %v1094_v48 }
 0x197   : > { %v1021_v46 = vsel %vm1007_vm3, %v4531_v23, %v4530_v19  ;;  %v4053_v39 = vadd.f32 %v1652_v20, %v1616_v14  ;;  %v1576_v1 = vmul.f32 %v2940_v8, %v1039_v18  ;;  %v1538_v17 = vadd.f32 %v1506_v13, %v1468_v54  ;;  %v4534_v19 = vld [vmem:[#allocation23_spill] sm:$0xff] }
 0x198   : > { %v1112_v62 = vsel %vm1080_vm4, %v4533_v36, %v4532_v2  ;;  %v1165_v57 = vmul.f32 %v2817_v10, %v1021_v46  ;;  %v1644_v61 = vmul.f32 %v2923_v38, %v3656_v55  ;;  %v1714_v30 = vmul.f32 %v3886_v21, %v1094_v48 }
 0x199   : > { %v1469_v23 = vadd.f32 %v4534_v19, %v1401_v15  ;;  %v1303_v63 = vmul.f32 %v2845_v24, %v1112_v62  ;;  %v1577_v14 = vmul.f32 %v2879_v53, %v1021_v46  ;;  %v4535_v40 = vrot.slane %v3741_v22, 7 }
 0x19a   : > { %v1265_v36 = vadd.f32 %v3651_v37, %v1165_v57  ;;  %v4536_v18 = vrot.slane %v3702_v51, 7  ;;  %v1608_v2 = vadd.f32 %v1576_v1, %v1538_v17  ;;  %v4537_v55 = vrot.slane %v3702_v51, 1 }
 0x19b   : > { %v1539_v20 = vadd.f32 %v1507_v45, %v1469_v23  ;;  %v4538_v48 = vrot.slane %v3741_v22, 1  ;;  %v1371_v15 = vmul.f32 %v2849_v29, %v1021_v46  ;;  %v1645_v57 = vmul.f32 %v2923_v38, %v3619_v33 }
 0x19c   : > { %v1040_v13 = vsel %vm1007_vm3, %v4536_v18, %v4535_v40  ;;  %v1335_v54 = vadd.f32 %v1303_v63, %v1265_v36  ;;  %v1402_v19 = vadd.f32 %v1370_v34, %v3953_v35  ;;  %v1676_v40 = vadd.f32 %v1644_v61, %v1608_v2 }
 0x19d   : > { %v1095_v37 = vsel %vm1080_vm4, %v4538_v48, %v4537_v55  ;;  %v1166_v49 = vmul.f32 %v2841_v5, %v1040_v13  ;;  %v1609_v1 = vadd.f32 %v1577_v14, %v1539_v20  ;;  %v1509_v23 = vmul.f32 %v2887_v60, %v1112_v62 }
 0x19e   : > { %v1304_v17 = vmul.f32 %v2823_v12, %v1095_v37  ;;  %v1715_v18 = vmul.f32 %v2944_v47, %v1112_v62  ;;  %v1372_v5 = vmul.f32 %v2876_v52, %v1040_v13  ;;  %v1470_v36 = vadd.f32 %v3695_v28, %v1402_v19 }
 0x19f   : > { %v1266_v45 = vadd.f32 %v3782_v56, %v1166_v49  ;;  %v1746_v46 = vadd.f32 %v1714_v30, %v1676_v40  ;;  %v1677_v63 = vadd.f32 %v1645_v57, %v1609_v1  ;;  %v4539_v33 = vrot.slane %v3702_v51, 7 }
 0x1a0   : > { %v4540_v35 = vrot.slane %v3741_v22, 7  ;;  %v1540_v34 = vadd.f32 %v1508_v58, %v1470_v36  ;;  %v1578_v12 = vmul.f32 %v2940_v8, %v1040_v13  ;;  %v4541_v61 = vmov %v4538_v48 }
 0x1a1   : > { %v1336_v55 = vadd.f32 %v1304_v17, %v1266_v45  ;;  %v4542_v62 = vrot.slane %v3702_v51, 1  ;;  %v1785_v14 = vadd.f32 %v4009_v31, %v1746_v46  ;;  %v1747_v2 = vadd.f32 %v1715_v18, %v1677_v63 }
 0x1a2   : > { %v1022_v56 = vsel %vm1007_vm3, %v4540_v35, %v4539_v33  ;;  %v1510_v20 = vmul.f32 %v2869_v42, %v1095_v37  ;;  %v1403_v48 = vadd.f32 %v1371_v15, %v3991_v43  ;;  %v1610_v49 = vadd.f32 %v1578_v12, %v1540_v34 }
 0x1a3   : > { %v1113_v28 = vsel %vm1080_vm4, %v4542_v62, %v4541_v61  ;;  %v1167_v30 = vmul.f32 %v2817_v10, %v1022_v56  ;;  %v1646_v58 = vmul.f32 %v2923_v38, %v3741_v22  ;;  %2470 = vmatprep.mubr.f32.mxu1 %v1785_v14  ;;  %v1786_v19 = vadd.f32 %v4009_v31, %v1747_v2 }
 0x1a4   : > { %v1305_v57 = vmul.f32 %v2845_v24, %v1113_v28  ;;  %v1716_v40 = vmul.f32 %v3886_v21, %v1095_v37  ;;  %v1373_v1 = vmul.f32 %v2849_v29, %v1022_v56  ;;  %v1471_v45 = vadd.f32 %v3663_v41, %v1403_v48 }
 0x1a5   : > { %v1267_v13 = vadd.f32 %v3736_v7, %v1167_v30  ;;  %v1678_v17 = vadd.f32 %v1646_v58, %v1610_v49  ;;  %v1511_v43 = vmul.f32 %v2887_v60, %v1113_v28  ;;  %v1404_v15 = vadd.f32 %v1372_v5, %v1334_v59  ;;  %2471 = vmatmul.mubr.f32.gmra.mrb[18].mxu1 %v1786_v19  ;;  %v4548_v49 = vld [vmem:[#allocation25_spill] sm:$0xff] }
 0x1a6   : > { %v1541_v22 = vadd.f32 %v1509_v23, %v1471_v45  ;;  %v1579_v7 = vmul.f32 %v2879_v53, %v1022_v56  ;;  %v1647_v36 = vmul.f32 %v2923_v38, %v3702_v51  ;;  %v4543_v46 = vrot.slane %v3760_v11, 7 }
 0x1a7   : > { %v1337_v18 = vadd.f32 %v1305_v57, %v1267_v13  ;;  %v4544_v37 = vrot.slane %v3798_v4, 7  ;;  %v1748_v41 = vadd.f32 %v1716_v40, %v1678_v17  ;;  %v1472_v33 = vadd.f32 %v3844_v50, %v1404_v15  ;;  %v4547_v50 = vld [vmem:[#allocation17_spill] sm:$0xff] }
 0x1a8   : > { %v4545_v35 = vrot.slane %v3798_v4, 1  ;;  %v4546_v59 = vrot.slane %v3760_v11, 1  ;;  %v1611_v51 = vadd.f32 %v1579_v7, %v1541_v22  ;;  %v1717_v56 = vmul.f32 %v2944_v47, %v1113_v28 }
 0x1a9   : > { %v1023_v63 = vsel %vm1007_vm3, %v4544_v37, %v4543_v46  ;;  %v1580_v34 = vmul.f32 %v2940_v8, %v3826_v44  ;;  %v1405_v12 = vadd.f32 %v1373_v1, %v1335_v54  ;;  %v1787_v61 = vadd.f32 %v4009_v31, %v1748_v41 }
 0x1aa   : > { %v1114_v23 = vsel %vm1080_vm4, %v4546_v59, %v4545_v35  ;;  %v1169_v5 = vmul.f32 %v2817_v10, %v1023_v63  ;;  %v1542_v62 = vadd.f32 %v1510_v20, %v1472_v33  ;;  %v1679_v2 = vadd.f32 %v1647_v36, %v1611_v51  ;;  %v4553_v35 = vld [vmem:[#allocation19_spill] sm:$0xff] }
 0x1ab   : > { %v1307_v14 = vmul.f32 %v2845_v24, %v1114_v23  ;;  %v1648_v48 = vmul.f32 %v2923_v38, %v3798_v4  ;;  %v1718_v10 = vmul.f32 %v3886_v21, %v3834_v3  ;;  %v1473_v28 = vadd.f32 %v4548_v49, %v1405_v12  ;;  %2473 = vmatprep.mubr.f32.mxu1 %v1787_v61 }
 0x1ac   : > { %v1269_v30 = vadd.f32 %v4547_v50, %v1169_v5  ;;  %v1612_v58 = vadd.f32 %v1580_v34, %v1542_v62  ;;  %v1375_v54 = vmul.f32 %v2849_v29, %v1023_v63  ;;  %v1374_v20 = vmul.f32 %v2876_v52, %v3826_v44  ;;  %v4556_v34 = vld [vmem:[#allocation12_spill] sm:$0xff] }
 0x1ad   : > { %v1749_v57 = vadd.f32 %v1717_v56, %v1679_v2  ;;  %v1513_v24 = vmul.f32 %v2887_v60, %v1114_v23  ;;  %v1543_v19 = vadd.f32 %v1511_v43, %v1473_v28  ;;  %v1581_v40 = vmul.f32 %v2879_v53, %v1023_v63  ;;  %v4559_v28 = vld [vmem:[#allocation26_spill] sm:$0xff] }
 0x1ae   : > { %v1339_v13 = vadd.f32 %v1307_v14, %v1269_v30  ;;  %v1680_v4 = vadd.f32 %v1648_v48, %v1612_v58  ;;  %v1649_v1 = vmul.f32 %v2923_v38, %v3760_v11  ;;  %v1406_v45 = vadd.f32 %v1374_v20, %v1336_v55 }
 0x1af   : > { %v4549_v17 = vrot.slane %v3855_v32, 7  ;;  %v4550_v15 = vrot.slane %v3900_v26, 7  ;;  %v1788_v52 = vadd.f32 %v4009_v31, %v1749_v57  ;;  %v1613_v44 = vadd.f32 %v1581_v40, %v1543_v19 }
 0x1b0   : > { %v4551_v7 = vrot.slane %v3900_v26, 1  ;;  %v4552_v43 = vrot.slane %v3855_v32, 1  ;;  %v1750_v55 = vadd.f32 %v1718_v10, %v1680_v4  ;;  %v1474_v46 = vadd.f32 %v3948_v9, %v1406_v45 }
 0x1b1   : > { %v1024_v22 = vsel %vm1007_vm3, %v4550_v15, %v4549_v17  ;;  %v1512_v37 = vmul.f32 %v2869_v42, %v3834_v3  ;;  %v1407_v63 = vadd.f32 %v1375_v54, %v1337_v18  ;;  %2474 = vmatmul.mubr.f32.gmra.mrb[20].mxu1 %v1788_v52  ;;  %v1681_v41 = vadd.f32 %v1649_v1, %v1613_v44 }
 0x1b2   : > { %v1115_v36 = vsel %vm1080_vm4, %v4552_v43, %v4551_v7  ;;  %v1377_v11 = vmul.f32 %v2849_v29, %v1024_v22  ;;  %v1719_v33 = vmul.f32 %v2944_v47, %v1114_v23  ;;  %v1582_v59 = vmul.f32 %v2940_v8, %v4553_v35 }
 0x1b3   : > { %v4554_v5 = vrot.slane %v3985_v25, 1  ;;  %v4555_v51 = vrot.slane %v3989_v27, 1  ;;  %v1789_v9 = vadd.f32 %v4009_v31, %v1750_v55  ;;  %v1544_v56 = vadd.f32 %v1512_v37, %v1474_v46 }
 0x1b4   : > { %v1475_v42 = vadd.f32 %v4556_v34, %v1407_v63  ;;  %v1650_v18 = vmul.f32 %v2923_v38, %v3900_v26  ;;  %v1751_v23 = vadd.f32 %v1719_v33, %v1681_v41  ;;  %v1409_v62 = vadd.f32 %v1377_v11, %v1339_v13 }
 0x1b5   : > { %v1098_v29 = vsel %vm1080_vm4, %v4555_v51, %v4554_v5  ;;  %v4557_v8 = vmov %v4555_v51  ;;  %v4558_v12 = vmov %v4554_v5  ;;  %2476 = vmatprep.mubr.f32.mxu1 %v1789_v9  ;;  %v1614_v50 = vadd.f32 %v1582_v59, %v1544_v56 }
 0x1b6   : > { %v1722_v3 = vmul.f32 %v3886_v21, %v1098_v29  ;;  %v1116_v61 = vsel %vm1080_vm4, %v4558_v12, %v4557_v8  ;;  %v1545_v30 = vadd.f32 %v1513_v24, %v1475_v42  ;;  %v1583_v14 = vmul.f32 %v2879_v53, %v1024_v22 }
 0x1b7   : > { %v1585_v48 = vmul.f32 %v2879_v53, %v4025_v6  ;;  %v1790_v26 = vadd.f32 %v4009_v31, %v1751_v23  ;;  %v1515_v27 = vmul.f32 %v2887_v60, %v1115_v36  ;;  %v1477_v10 = vadd.f32 %v3974_v16, %v1409_v62 }
 0x1b8   : > { %v1754_v2 = vadd.f32 %v1722_v3, %v4053_v39  ;;  %v1651_v0 = vmul.f32 %v2923_v38, %v3855_v32  ;;  %v1682_v49 = vadd.f32 %v1650_v18, %v1614_v50  ;;  %v1720_v58 = vmul.f32 %v3886_v21, %v4559_v28 }
 0x1b9   : > { %v1615_v13 = vadd.f32 %v1583_v14, %v1545_v30  ;;  %2477 = vmatmul.mubr.f32.gmra.mrb[22].mxu1 %v1790_v26  ;;  %v1547_v54 = vadd.f32 %v1515_v27, %v1477_v10  ;;  %v1721_v53 = vmul.f32 %v2944_v47, %v1115_v36  ;;  %v1653_v60 = vmul.f32 %v2923_v38, %v3985_v25  ;;  %v4208_v38 = vld [vmem:[%s4330_s8] ss:$0 sm:$0xff] }
 0x1ba   : > { %v1752_v39 = vadd.f32 %v1720_v58, %v1682_v49  ;;  %v1793_v32 = vadd.f32 %v4009_v31, %v1754_v2  ;;  %v1723_v21 = vmul.f32 %v2944_v47, %v1116_v61 }
 0x1bb   : > { %v1683_v20 = vadd.f32 %v1651_v0, %v1615_v13  ;;  %v1617_v6 = vadd.f32 %v1585_v48, %v1547_v54 }
 0x1bc   : > { %v1791_v16 = vadd.f32 %v4009_v31, %v1752_v39 }
 0x1bd   : > { %v1753_v57 = vadd.f32 %v1721_v53, %v1683_v20  ;;  %v1685_v24 = vadd.f32 %v1653_v60, %v1617_v6 }
 0x1be   : > { %2479 = vmatprep.mubr.f32.mxu1 %v1791_v16 }
 0x1bf   : > { %v1792_v19 = vadd.f32 %v4009_v31, %v1753_v57  ;;  %v1755_v40 = vadd.f32 %v1723_v21, %v1685_v24 }
 0x1c1   : > { %2480 = vmatmul.mubr.f32.gmra.mrb[24].mxu1 %v1792_v19  ;;  %v1794_v4 = vadd.f32 %v4009_v31, %v1755_v40 }
 0x1c2   : > { %2482 = vmatprep.mubr.f32.mxu1 %v1793_v32 }
 0x1c5   : > { %2483 = vmatmul.mubr.f32.gmra.mrb[26].mxu1 %v1794_v4 }
 0x1e6   : > { %v2439_v47 = vpop.f32.mrb[36].mxu0 }
 0x1e7   : > { %v1890_v25 = vadd.f32 %v2439_v47, %v4208_v38  ;;  %v1884_v31 = vpop.f32.mrb[37].mxu0 }
 0x1e8   : > { %v1885_v1 = vadd.f32 %v4208_v38, %v1884_v31 }
 0x1e9   : > { %2044 = vst.msk [vmem:[%s4215_s16 + $0x8] sm:$0xff] %vm554_vm0, %v1890_v25 }
 0x1ea   : > { %2043 = vst.msk [vmem:[%s4215_s16] sm:$0xff] %vm554_vm0, %v1885_v1 }
 0x1f7   : > { %v2442_v45 = vpop.f32.mrb[38].mxu0 }
 0x1f8   : > { %v1900_v17 = vadd.f32 %v2442_v45, %v4208_v38  ;;  %v1894_v15 = vpop.f32.mrb[39].mxu0 }
 0x1f9   : > { %v1895_v22 = vadd.f32 %v4208_v38, %v1894_v15 }
 0x1fa   : > { %2046 = vst.msk [vmem:[%s4215_s16 + $0x18] sm:$0xff] %vm554_vm0, %v1900_v17 }
 0x1fb   : > { %2045 = vst.msk [vmem:[%s4215_s16 + $0x10] sm:$0xff] %vm554_vm0, %v1895_v22 }
 0x209   : > { %v2445_v52 = vpop.f32.mrb[0].mxu1 }
 0x20a   : > { %v1910_v44 = vadd.f32 %v2445_v52, %v4208_v38  ;;  %v1904_v7 = vpop.f32.mrb[1].mxu1 }
 0x20b   : > { %v1905_v43 = vadd.f32 %v4208_v38, %v1904_v7 }
 0x20c   : > { %2048 = vst.msk [vmem:[%s4215_s16 + $0x28] sm:$0xff] %vm554_vm0, %v1910_v44 }
 0x20d   : > { %2047 = vst.msk [vmem:[%s4215_s16 + $0x20] sm:$0xff] %vm554_vm0, %v1905_v43 }
 0x210   : > { %v2448_v36 = vpop.f32.mrb[2].mxu1 }
 0x211   : > { %v1920_v11 = vadd.f32 %v2448_v36, %v4208_v38  ;;  %v1914_v55 = vpop.f32.mrb[3].mxu1 }
 0x212   : > { %v1915_v46 = vadd.f32 %v4208_v38, %v1914_v55 }
 0x213   : > { %2050 = vst.msk [vmem:[%s4215_s16 + $0x38] sm:$0xff] %vm554_vm0, %v1920_v11 }
 0x214   : > { %2049 = vst.msk [vmem:[%s4215_s16 + $0x30] sm:$0xff] %vm554_vm0, %v1915_v46 }
 0x21b   : > { %v2451_v37 = vpop.f32.mrb[4].mxu1 }
 0x21c   : > { %v1930_v63 = vadd.f32 %v2451_v37, %v4208_v38  ;;  %v1924_v41 = vpop.f32.mrb[5].mxu1 }
 0x21d   : > { %v1925_v33 = vadd.f32 %v4208_v38, %v1924_v41 }
 0x21e   : > { %2052 = vst.msk [vmem:[%s4215_s16 + $0x48] sm:$0xff] %vm554_vm0, %v1930_v63 }
 0x21f   : > { %2051 = vst.msk [vmem:[%s4215_s16 + $0x40] sm:$0xff] %vm554_vm0, %v1925_v33 }
 0x229   : > { %v2454_v35 = vpop.f32.mrb[6].mxu1 }
 0x22a   : > { %v1940_v59 = vadd.f32 %v2454_v35, %v4208_v38  ;;  %v1934_v5 = vpop.f32.mrb[7].mxu1 }
 0x22b   : > { %v1935_v51 = vadd.f32 %v4208_v38, %v1934_v5 }
 0x22c   : > { %2054 = vst.msk [vmem:[%s4215_s16 + $0x58] sm:$0xff] %vm554_vm0, %v1940_v59 }
 0x22d   : > { %2053 = vst.msk [vmem:[%s4215_s16 + $0x50] sm:$0xff] %vm554_vm0, %v1935_v51 }
 0x235   : > { %v2457_v29 = vpop.f32.mrb[8].mxu1 }
 0x236   : > { %v1950_v9 = vadd.f32 %v2457_v29, %v4208_v38  ;;  %v1944_v56 = vpop.f32.mrb[9].mxu1 }
 0x237   : > { %v1945_v34 = vadd.f32 %v4208_v38, %v1944_v56 }
 0x238   : > { %2056 = vst.msk [vmem:[%s4215_s16 + $0x68] sm:$0xff] %vm554_vm0, %v1950_v9 }
 0x239   : > { %2055 = vst.msk [vmem:[%s4215_s16 + $0x60] sm:$0xff] %vm554_vm0, %v1945_v34 }
 0x240   : > { %v2460_v42 = vpop.f32.mrb[10].mxu1 }
 0x241   : > { %v1960_v3 = vadd.f32 %v2460_v42, %v4208_v38  ;;  %v1954_v18 = vpop.f32.mrb[11].mxu1 }
 0x242   : > { %v1955_v23 = vadd.f32 %v4208_v38, %v1954_v18 }
 0x243   : > { %2058 = vst.msk [vmem:[%s4215_s16 + $0x78] sm:$0xff] %vm554_vm0, %v1960_v3 }
 0x244   : > { %2057 = vst.msk [vmem:[%s4215_s16 + $0x70] sm:$0xff] %vm554_vm0, %v1955_v23 }
 0x24e   : > { %v2463_v8 = vpop.f32.mrb[12].mxu1 }
 0x24f   : > { %v1970_v12 = vadd.f32 %v2463_v8, %v4208_v38  ;;  %v1964_v61 = vpop.f32.mrb[13].mxu1 }
 0x250   : > { %v1965_v62 = vadd.f32 %v4208_v38, %v1964_v61 }
 0x251   : > { %2060 = vst.msk [vmem:[%s4215_s16 + $0x88] sm:$0xff] %vm554_vm0, %v1970_v12 }
 0x252   : > { %2059 = vst.msk [vmem:[%s4215_s16 + $0x80] sm:$0xff] %vm554_vm0, %v1965_v62 }
 0x25f   : > { %v2466_v50 = vpop.f32.mrb[14].mxu1 }
 0x260   : > { %v1980_v30 = vadd.f32 %v2466_v50, %v4208_v38  ;;  %v1974_v14 = vpop.f32.mrb[15].mxu1 }
 0x261   : > { %v1975_v2 = vadd.f32 %v4208_v38, %v1974_v14 }
 0x262   : > { %2062 = vst.msk [vmem:[%s4215_s16 + $0x98] sm:$0xff] %vm554_vm0, %v1980_v30 }
 0x263   : > { %2061 = vst.msk [vmem:[%s4215_s16 + $0x90] sm:$0xff] %vm554_vm0, %v1975_v2 }
 0x269   : > { %v2469_v48 = vpop.f32.mrb[16].mxu1 }
 0x26a   : > { %v1990_v26 = vadd.f32 %v2469_v48, %v4208_v38  ;;  %v1984_v27 = vpop.f32.mrb[17].mxu1 }
 0x26b   : > { %v1985_v10 = vadd.f32 %v4208_v38, %v1984_v27 }
 0x26c   : > { %2064 = vst.msk [vmem:[%s4215_s16 + $0xa8] sm:$0xff] %vm554_vm0, %v1990_v26 }
 0x26d   : > { %2063 = vst.msk [vmem:[%s4215_s16 + $0xa0] sm:$0xff] %vm554_vm0, %v1985_v10 }
 0x278   : > { %v2472_v0 = vpop.f32.mrb[18].mxu1 }
 0x279   : > { %v2000_v49 = vadd.f32 %v2472_v0, %v4208_v38  ;;  %v1994_v28 = vpop.f32.mrb[19].mxu1 }
 0x27a   : > { %v1995_v58 = vadd.f32 %v4208_v38, %v1994_v28 }
 0x27b   : > { %2066 = vst.msk [vmem:[%s4215_s16 + $0xb8] sm:$0xff] %vm554_vm0, %v2000_v49 }
 0x27c   : > { %2065 = vst.msk [vmem:[%s4215_s16 + $0xb0] sm:$0xff] %vm554_vm0, %v1995_v58 }
 0x284   : > { %v2475_v13 = vpop.f32.mrb[20].mxu1 }
 0x285   : > { %v2010_v54 = vadd.f32 %v2475_v13, %v4208_v38  ;;  %v2004_v39 = vpop.f32.mrb[21].mxu1 }
 0x286   : > { %v2005_v20 = vadd.f32 %v4208_v38, %v2004_v39 }
 0x287   : > { %2068 = vst.msk [vmem:[%s4215_s16 + $0xc8] sm:$0xff] %vm554_vm0, %v2010_v54 }
 0x288   : > { %2067 = vst.msk [vmem:[%s4215_s16 + $0xc0] sm:$0xff] %vm554_vm0, %v2005_v20 }
 0x28c   : > { %v2478_v53 = vpop.f32.mrb[22].mxu1 }
 0x28d   : > { %v2020_v60 = vadd.f32 %v2478_v53, %v4208_v38  ;;  %v2014_v6 = vpop.f32.mrb[23].mxu1 }
 0x28e   : > { %v2015_v16 = vadd.f32 %v4208_v38, %v2014_v6 }
 0x28f   : > { %2070 = vst.msk [vmem:[%s4215_s16 + $0xd8] sm:$0xff] %vm554_vm0, %v2020_v60 }
 0x290   : > { %2069 = vst.msk [vmem:[%s4215_s16 + $0xd0] sm:$0xff] %vm554_vm0, %v2015_v16 }
 0x294   : > { %v2481_v57 = vpop.f32.mrb[24].mxu1 }
 0x295   : > { %v2030_v32 = vadd.f32 %v2481_v57, %v4208_v38  ;;  %v2024_v24 = vpop.f32.mrb[25].mxu1 }
 0x296   : > { %v2025_v21 = vadd.f32 %v4208_v38, %v2024_v24 }
 0x297   : > { %2072 = vst.msk [vmem:[%s4215_s16 + $0xe8] sm:$0xff] %vm554_vm0, %v2030_v32 }
 0x298   : > { %2071 = vst.msk [vmem:[%s4215_s16 + $0xe0] sm:$0xff] %vm554_vm0, %v2025_v21  ;;  %v2484_v19 = vpop.f32.mrb[26].mxu1 }
 0x299   : > { %v2040_v40 = vadd.f32 %v2484_v19, %v4208_v38  ;;  %v2034_v4 = vpop.f32.mrb[27].mxu1 }
 0x29a   : > { %v2035_v47 = vadd.f32 %v4208_v38, %v2034_v4 }
 0x29b   : > { %2074 = vst.msk [vmem:[%s4215_s16 + $0xf8] sm:$0xff] %vm554_vm0, %v2040_v40 }
 0x29c   : > { %2073 = vst.msk [vmem:[%s4215_s16 + $0xf0] sm:$0xff] %vm554_vm0, %v2035_v47 }
 0x29d PF: > { %s19_s30 = sadd.s32 1, %s2590_s30   ;;  %s4560_s28 = smov %s2586_s29 }
 0x29e   : > { %p16_p5 = scmp.ge.s32.totalorder %s19_s30, 4   ;;  %s4561_s29 = smov %s4563_s10 }
 0x2a0   :  { %18 = sbr.rel (!%p16_p5) target bundleno = 2 (0x2), region = 92 }

</bundles_post_ra>
